<compile_context>
chip_gen: v7x
topology: tpu7x:2x2x1
jax: 0.10.0
libtpu: 0.0.40
codegen_flags: <defaults>
</compile_context>

<pallas_src>
import jax
import jax.numpy as jnp
from jax import lax
from jax.experimental import pallas as pl
from jax.experimental.pallas import tpu as pltpu

# ----------------------- small, module-consistent config -----------------------
VOCAB = 32      # vocab_size
EMBED = 32      # embedding_size
HIDDEN = 32     # hidden_size
B = 2           # batch
T = 8           # sequence length (words.size(1))
CTX_LEN = 4     # context length (ctx.size(1))
PAD_IDX = 0     # padding_idx

NEG_INF = jnp.float32(-1e30)


# --------------------------- fused forward kernel ---------------------------
def fused_kernel(embeds_ref,                 # (T, Bp, E)   f32  time-major embeddings
                 h0_ref, c0_ref,             # (Bp, H)      f32
                 wih_ref,                    # (E, 4H)      bf16 fused input-proj weight
                 whh_ref,                    # (H, 4H)      bf16 fused recurrent weight
                 bias_ref,                   # (1, 4H)      f32  b_ih + b_hh
                 ctx_ref,                    # (B, L, H)    f32
                 mask_bias_ref,              # (B, 1, L)    f32  additive (0 / -1e30)
                 w_in_ref,                   # (H, H)       bf16
                 w_out_c_ref,                # (H, H)       bf16
                 w_out_h_ref,                # (H, H)       bf16
                 w_proj_ref,                 # (H, V)       bf16
                 b_proj_ref,                 # (1, V)       f32
                 logit_ref,                  # out: (B, T, V) f32
                 h1_ref, c1_ref,             # out: (B, H)    f32
                 gx_sc,                      # scratch: (T, Bp, 4H) f32
                 xs_sc):                     # scratch: (T, Bp, H)  f32
    Tn, Bp, E = embeds_ref.shape
    H = h0_ref.shape[-1]
    Bn, L, _ = ctx_ref.shape

    # ---- fused hoisted input projection: ONE (T*Bp, E) @ (E, 4H) MXU matmul ----
    x2 = embeds_ref[...].reshape(Tn * Bp, E).astype(jnp.bfloat16)
    gx_sc[...] = (jnp.dot(x2, wih_ref[...], preferred_element_type=jnp.float32)
                  + bias_ref[...]).reshape(Tn, Bp, 4 * H)

    whh = whh_ref[...]                                        # (H, 4H) bf16, hoisted

    # ---- serial recurrence: ONE fused (Bp,H)@(H,4H) matmul per timestep ----
    def step(t, carry):
        h, c = carry
        gates = gx_sc[t] + jnp.dot(h.astype(jnp.bfloat16), whh,
                                   preferred_element_type=jnp.float32)   # (Bp, 4H)
        i_g = jax.nn.sigmoid(gates[:, 0 * H:1 * H])
        f_g = jax.nn.sigmoid(gates[:, 1 * H:2 * H])
        g_g = jnp.tanh(gates[:, 2 * H:3 * H])
        o_g = jax.nn.sigmoid(gates[:, 3 * H:4 * H])
        c_new = f_g * c + i_g * g_g
        h_new = o_g * jnp.tanh(c_new)
        xs_sc[t] = h_new
        return h_new, c_new

    h_fin, c_fin = lax.fori_loop(0, Tn, step, (h0_ref[...], c0_ref[...]), unroll=True)
    h1_ref[...] = h_fin[:Bn]
    c1_ref[...] = c_fin[:Bn]

    # ---- SoftDotAttention + vocab projection, fused in the tail (no 2nd launch) ----
    xs = xs_sc[...]                                           # (T, Bp, H) f32
    w_in = w_in_ref[...]
    w_out_c = w_out_c_ref[...]
    w_out_h = w_out_h_ref[...]
    w_proj = w_proj_ref[...]
    b_proj = b_proj_ref[...]

    for b in range(Bn):                                       # B=2, unrolled at trace time
        x_b = xs[:, b, :]                                     # (T, H) f32
        x_bf = x_b.astype(jnp.bfloat16)
        ctx_b = ctx_ref[b].astype(jnp.bfloat16)               # (L, H)

        # target = linear_in(h); scores contract over shared H axis (no ctx^T input)
        target = jnp.dot(x_bf, w_in, preferred_element_type=jnp.float32)       # (T, H)
        scores = lax.dot_general(target.astype(jnp.bfloat16), ctx_b,
                                 dimension_numbers=(((1,), (1,)), ((), ())),
                                 preferred_element_type=jnp.float32)            # (T, L)

        # additive mask bias + softmax over ctx positions (f32 elementwise)
        scores = scores + mask_bias_ref[b]
        scores = scores - jnp.max(scores, axis=-1, keepdims=True)
        e = jnp.exp(scores)
        attn_w = e * pl.reciprocal(jnp.sum(e, axis=-1, keepdims=True), approx=True)

        # weighted_context = attn @ ctx ; h_tilde = tanh(linear_out([weighted, h]))
        weighted = jnp.dot(attn_w.astype(jnp.bfloat16), ctx_b,
                           preferred_element_type=jnp.float32)                  # (T, H)
        h_tilde = jnp.tanh(
            jnp.dot(weighted.astype(jnp.bfloat16), w_out_c,
                    preferred_element_type=jnp.float32)
            + jnp.dot(x_bf, w_out_h, preferred_element_type=jnp.float32))

        # logit = projection(h_tilde)
        logit_ref[b] = (jnp.dot(h_tilde.astype(jnp.bfloat16), w_proj,
                                preferred_element_type=jnp.float32) + b_proj)


def run_fused(embeds_tbe, h0_p, c0_p, wih_all, whh_all, bias_all,
              ctx, mask_bias, w_in_T, w_out_c_T, w_out_h_T, w_proj_T, b_proj):
    Tn, Bp, _E = embeds_tbe.shape
    H = h0_p.shape[-1]
    Bn = ctx.shape[0]
    V = w_proj_T.shape[-1]
    vmem = pl.BlockSpec(memory_space=pltpu.MemorySpace.VMEM)
    out_shapes = (
        jax.ShapeDtypeStruct((Bn, Tn, V), jnp.float32),   # logit
        jax.ShapeDtypeStruct((Bn, H), jnp.float32),       # h1
        jax.ShapeDtypeStruct((Bn, H), jnp.float32),       # c1
    )
    return pl.pallas_call(
        fused_kernel,
        out_shape=out_shapes,
        in_specs=[vmem] * 13,
        out_specs=(vmem, vmem, vmem),
        scratch_shapes=[pltpu.VMEM((Tn, Bp, 4 * H), jnp.float32),
                        pltpu.VMEM((Tn, Bp, H), jnp.float32)],
    )(embeds_tbe, h0_p, c0_p, wih_all, whh_all, bias_all,
      ctx, mask_bias, w_in_T, w_out_c_T, w_out_h_T, w_proj_T, b_proj)


# ----------------------------------- forward glue -----------------------------------
def speaker_decoder_forward(params, words, ctx, ctx_mask, h0, c0):
    Bn, _Tn = words.shape

    # embedding lookup (gather) stays as plain JAX glue; dropout = identity (eval mode)
    embeds = params["embedding"][words]              # (B, T, E)
    embeds_tbe = jnp.transpose(embeds, (1, 0, 2))    # time-major (T, B, E)

    # pad batch to the 8-sublane width for the recurrent kernel
    Bp = ((Bn + 7) // 8) * 8
    pad = Bp - Bn
    embeds_tbe = jnp.pad(embeds_tbe, ((0, 0), (0, pad), (0, 0)))
    h0_p = jnp.pad(h0, ((0, pad), (0, 0)))
    c0_p = jnp.pad(c0, ((0, pad), (0, 0)))

    # additive attention mask bias: 0 for valid, -1e30 for padded ctx positions
    mask_bias = jnp.where(ctx_mask, NEG_INF, jnp.float32(0.0))[:, None, :]   # (B, 1, L)

    logit, h1, c1 = run_fused(
        embeds_tbe, h0_p, c0_p,
        params["wih_all"], params["whh_all"], params["bias_all"],
        ctx, mask_bias,
        params["w_in_T"], params["w_out_c_T"], params["w_out_h_T"],
        params["w_proj_T"], params["b_proj"])
    return logit, h1, c1


# --------------------------------- parameter init ---------------------------------
def init_params(key):
    ks = jax.random.split(key, 9)

    def init(k, shape, scale=0.1):
        return (scale * jax.random.normal(k, shape)).astype(jnp.float32)

    emb = init(ks[0], (VOCAB, EMBED)).at[PAD_IDX].set(0.0)   # padding_idx row is zero

    H = HIDDEN
    w_ih = init(ks[1], (4 * H, EMBED))           # lstm.weight_ih_l0 (PyTorch i,f,g,o layout)
    w_hh = init(ks[2], (4 * H, H))               # lstm.weight_hh_l0
    b_ih = init(ks[3], (4 * H,))                 # lstm.bias_ih_l0
    b_hh = init(ks[4], (4 * H,))                 # lstm.bias_hh_l0

    # fused, pre-transposed (in, 4H) weights; bf16 operands, f32 bias baked once
    wih_all = jnp.transpose(w_ih).astype(jnp.bfloat16)       # (E, 4H)
    whh_all = jnp.transpose(w_hh).astype(jnp.bfloat16)       # (H, 4H)
    bias_all = (b_ih + b_hh).reshape(1, 4 * H)               # (1, 4H) f32

    w_in = init(ks[5], (H, H))                   # attention_layer.linear_in (no bias)
    w_out = init(ks[6], (H, 2 * H))              # attention_layer.linear_out (no bias)
    w_in_T = jnp.transpose(w_in).astype(jnp.bfloat16)
    w_out_c_T = jnp.transpose(w_out[:, :H]).astype(jnp.bfloat16)   # acts on weighted_context
    w_out_h_T = jnp.transpose(w_out[:, H:]).astype(jnp.bfloat16)   # acts on h

    w_proj = init(ks[7], (VOCAB, H))             # projection.weight
    b_proj = init(ks[8], (VOCAB,)).reshape(1, VOCAB)
    w_proj_T = jnp.transpose(w_proj).astype(jnp.bfloat16)

    # TODO(synk): baseline_projection params not created — unused in forward().
    return dict(embedding=emb, wih_all=wih_all, whh_all=whh_all, bias_all=bias_all,
                w_in_T=w_in_T, w_out_c_T=w_out_c_T, w_out_h_T=w_out_h_T,
                w_proj_T=w_proj_T, b_proj=b_proj)


if __name__ == "__main__":
    key = jax.random.PRNGKey(0)
    pk, wk, ck, hk, c2k = jax.random.split(key, 5)
    params = init_params(pk)

    words = jax.random.randint(wk, (B, T), 0, VOCAB).astype(jnp.int32)
    ctx = (0.1 * jax.random.normal(ck, (B, CTX_LEN, HIDDEN))).astype(jnp.float32)
    ctx_mask = jnp.array([[False, False, False, False],
                          [False, False, True, True]])        # True = padded ctx position
    h0 = (0.1 * jax.random.normal(hk, (B, HIDDEN))).astype(jnp.float32)
    c0 = (0.1 * jax.random.normal(c2k, (B, HIDDEN))).astype(jnp.float32)

    fwd = jax.jit(speaker_decoder_forward)
    logit, h1, c1 = fwd(params, words, ctx, ctx_mask, h0, c0)
    jax.block_until_ready((logit, h1, c1))

    assert logit.shape == (B, T, VOCAB)
    assert h1.shape == (B, HIDDEN) and c1.shape == (B, HIDDEN)
    assert bool(jnp.all(jnp.isfinite(logit)))
    assert bool(jnp.all(jnp.isfinite(h1))) and bool(jnp.all(jnp.isfinite(c1)))
    print("KERNEL_OK")
</pallas_src>

<mosaic_0001>
module attributes {stable_mosaic.version = 11 : i64} {
  func.func @fused_kernel(%arg0: memref<8x8x32xf32, #tpu.memory_space<vmem>>, %arg1: memref<8x32xf32, #tpu.memory_space<vmem>>, %arg2: memref<8x32xf32, #tpu.memory_space<vmem>>, %arg3: memref<32x128xbf16, #tpu.memory_space<vmem>>, %arg4: memref<32x128xbf16, #tpu.memory_space<vmem>>, %arg5: memref<1x128xf32, #tpu.memory_space<vmem>>, %arg6: memref<2x4x32xf32, #tpu.memory_space<vmem>>, %arg7: memref<2x1x4xf32, #tpu.memory_space<vmem>>, %arg8: memref<32x32xbf16, #tpu.memory_space<vmem>>, %arg9: memref<32x32xbf16, #tpu.memory_space<vmem>>, %arg10: memref<32x32xbf16, #tpu.memory_space<vmem>>, %arg11: memref<32x32xbf16, #tpu.memory_space<vmem>>, %arg12: memref<1x32xf32, #tpu.memory_space<vmem>>, %arg13: memref<2x8x32xf32, #tpu.memory_space<vmem>>, %arg14: memref<2x32xf32, #tpu.memory_space<vmem>>, %arg15: memref<2x32xf32, #tpu.memory_space<vmem>>, %arg16: memref<8x8x128xf32, #tpu.memory_space<vmem>>, %arg17: memref<8x8x32xf32, #tpu.memory_space<vmem>>) attributes {dimension_semantics = [], scalar_prefetch = 0 : i64, scratch_operands = 2 : i64, tpu.core_type = #tpu.core_type<tc>} {
    %c0 = arith.constant 0 : index
    %c0_0 = arith.constant 0 : index
    %c0_1 = arith.constant 0 : index
    %0 = vector.load %arg0[%c0, %c0_0, %c0_1] : memref<8x8x32xf32, #tpu.memory_space<vmem>>, vector<8x8x32xf32>
    %1 = vector.shape_cast %0 : vector<8x8x32xf32> to vector<64x32xf32>
    %2 = arith.truncf %1 : vector<64x32xf32> to vector<64x32xbf16>
    %c0_2 = arith.constant 0 : index
    %c0_3 = arith.constant 0 : index
    %3 = vector.load %arg3[%c0_2, %c0_3] : memref<32x128xbf16, #tpu.memory_space<vmem>>, vector<32x128xbf16>
    %cst = arith.constant dense<0.000000e+00> : vector<64x128xf32>
    %4 = tpu.matmul %2, %3, %cst {dimension_numbers = #tpu.dot_dimension_numbers<[1], [0], [0], [1], [0, 0, 1, 1], [], []>} : vector<64x32xbf16>, vector<32x128xbf16>, vector<64x128xf32> -> vector<64x128xf32>
    %c0_4 = arith.constant 0 : index
    %c0_5 = arith.constant 0 : index
    %5 = vector.load %arg5[%c0_4, %c0_5] : memref<1x128xf32, #tpu.memory_space<vmem>>, vector<1x128xf32>
    %6 = vector.broadcast %5 : vector<1x128xf32> to vector<64x128xf32>
    %7 = arith.addf %4, %6 : vector<64x128xf32>
    %8 = vector.shape_cast %7 : vector<64x128xf32> to vector<8x8x128xf32>
    %c0_6 = arith.constant 0 : index
    %c0_7 = arith.constant 0 : index
    %c0_8 = arith.constant 0 : index
    %9 = vector.load %arg16[%c0_6, %c0_7, %c0_8] : memref<8x8x128xf32, #tpu.memory_space<vmem>>, vector<8x8x128xf32>
    tpu.vector_store %arg16[%c0_6, %c0_7, %c0_8], %8 {strides = array<i32>} : memref<8x8x128xf32, #tpu.memory_space<vmem>>, vector<8x8x128xf32>,
    %c0_9 = arith.constant 0 : index
    %c0_10 = arith.constant 0 : index
    %10 = vector.load %arg4[%c0_9, %c0_10] : memref<32x128xbf16, #tpu.memory_space<vmem>>, vector<32x128xbf16>
    %c0_11 = arith.constant 0 : index
    %c0_12 = arith.constant 0 : index
    %11 = vector.load %arg1[%c0_11, %c0_12] : memref<8x32xf32, #tpu.memory_space<vmem>>, vector<8x32xf32>
    %c0_13 = arith.constant 0 : index
    %c0_14 = arith.constant 0 : index
    %12 = vector.load %arg2[%c0_13, %c0_14] : memref<8x32xf32, #tpu.memory_space<vmem>>, vector<8x32xf32>
    %c0_i32 = arith.constant 0 : i32
    %13 = arith.index_cast %c0_i32 : i32 to index
    %c0_15 = arith.constant 0 : index
    %c0_16 = arith.constant 0 : index
    %14 = vector.load %arg16[%13, %c0_15, %c0_16] : memref<8x8x128xf32, #tpu.memory_space<vmem>>, vector<1x8x128xf32>
    %15 = vector.shape_cast %14 : vector<1x8x128xf32> to vector<8x128xf32>
    %16 = arith.truncf %11 : vector<8x32xf32> to vector<8x32xbf16>
    %cst_17 = arith.constant dense<0.000000e+00> : vector<8x128xf32>
    %17 = tpu.matmul %16, %10, %cst_17 {dimension_numbers = #tpu.dot_dimension_numbers<[1], [0], [0], [1], [0, 0, 1, 1], [], []>} : vector<8x32xbf16>, vector<32x128xbf16>, vector<8x128xf32> -> vector<8x128xf32>
    %18 = arith.addf %15, %17 : vector<8x128xf32>
    %19 = vector.extract_strided_slice %18 {offsets = [0, 0], sizes = [8, 32], strides = [1, 1]} : vector<8x128xf32> to vector<8x32xf32>
    %20 = arith.negf %19 : vector<8x32xf32>
    %21 = math.exp %20 : vector<8x32xf32>
    %cst_18 = arith.constant 1.000000e+00 : f32
    %22 = vector.broadcast %cst_18 : f32 to vector<8x32xf32>
    %23 = arith.addf %22, %21 : vector<8x32xf32>
    %24 = arith.divf %22, %23 : vector<8x32xf32>
    %25 = vector.extract_strided_slice %18 {offsets = [0, 32], sizes = [8, 32], strides = [1, 1]} : vector<8x128xf32> to vector<8x32xf32>
    %26 = arith.negf %25 : vector<8x32xf32>
    %27 = math.exp %26 : vector<8x32xf32>
    %cst_19 = arith.constant 1.000000e+00 : f32
    %28 = vector.broadcast %cst_19 : f32 to vector<8x32xf32>
    %29 = arith.addf %28, %27 : vector<8x32xf32>
    %30 = arith.divf %28, %29 : vector<8x32xf32>
    %31 = vector.extract_strided_slice %18 {offsets = [0, 64], sizes = [8, 32], strides = [1, 1]} : vector<8x128xf32> to vector<8x32xf32>
    %32 = math.tanh %31 : vector<8x32xf32>
    %33 = vector.extract_strided_slice %18 {offsets = [0, 96], sizes = [8, 32], strides = [1, 1]} : vector<8x128xf32> to vector<8x32xf32>
    %34 = arith.negf %33 : vector<8x32xf32>
    %35 = math.exp %34 : vector<8x32xf32>
    %cst_20 = arith.constant 1.000000e+00 : f32
    %36 = vector.broadcast %cst_20 : f32 to vector<8x32xf32>
    %37 = arith.addf %36, %35 : vector<8x32xf32>
    %38 = arith.divf %36, %37 : vector<8x32xf32>
    %39 = arith.mulf %30, %12 : vector<8x32xf32>
    %40 = arith.mulf %24, %32 : vector<8x32xf32>
    %41 = arith.addf %39, %40 : vector<8x32xf32>
    %42 = math.tanh %41 : vector<8x32xf32>
    %43 = arith.mulf %38, %42 : vector<8x32xf32>
    %44 = arith.index_cast %c0_i32 : i32 to index
    %c0_21 = arith.constant 0 : index
    %c0_22 = arith.constant 0 : index
    %45 = vector.load %arg17[%44, %c0_21, %c0_22] : memref<8x8x32xf32, #tpu.memory_space<vmem>>, vector<1x8x32xf32>
    %46 = vector.shape_cast %45 : vector<1x8x32xf32> to vector<8x32xf32>
    %47 = vector.shape_cast %43 : vector<8x32xf32> to vector<1x8x32xf32>
    tpu.vector_store %arg17[%44, %c0_21, %c0_22], %47 {strides = array<i32>} : memref<8x8x32xf32, #tpu.memory_space<vmem>>, vector<1x8x32xf32>,
    %c1_i32 = arith.constant 1 : i32
    %48 = arith.index_cast %c1_i32 : i32 to index
    %c0_23 = arith.constant 0 : index
    %c0_24 = arith.constant 0 : index
    %49 = vector.load %arg16[%48, %c0_23, %c0_24] : memref<8x8x128xf32, #tpu.memory_space<vmem>>, vector<1x8x128xf32>
    %50 = vector.shape_cast %49 : vector<1x8x128xf32> to vector<8x128xf32>
    %51 = arith.truncf %43 : vector<8x32xf32> to vector<8x32xbf16>
    %cst_25 = arith.constant dense<0.000000e+00> : vector<8x128xf32>
    %52 = tpu.matmul %51, %10, %cst_25 {dimension_numbers = #tpu.dot_dimension_numbers<[1], [0], [0], [1], [0, 0, 1, 1], [], []>} : vector<8x32xbf16>, vector<32x128xbf16>, vector<8x128xf32> -> vector<8x128xf32>
    %53 = arith.addf %50, %52 : vector<8x128xf32>
    %54 = vector.extract_strided_slice %53 {offsets = [0, 0], sizes = [8, 32], strides = [1, 1]} : vector<8x128xf32> to vector<8x32xf32>
    %55 = arith.negf %54 : vector<8x32xf32>
    %56 = math.exp %55 : vector<8x32xf32>
    %cst_26 = arith.constant 1.000000e+00 : f32
    %57 = vector.broadcast %cst_26 : f32 to vector<8x32xf32>
    %58 = arith.addf %57, %56 : vector<8x32xf32>
    %59 = arith.divf %57, %58 : vector<8x32xf32>
    %60 = vector.extract_strided_slice %53 {offsets = [0, 32], sizes = [8, 32], strides = [1, 1]} : vector<8x128xf32> to vector<8x32xf32>
    %61 = arith.negf %60 : vector<8x32xf32>
    %62 = math.exp %61 : vector<8x32xf32>
    %cst_27 = arith.constant 1.000000e+00 : f32
    %63 = vector.broadcast %cst_27 : f32 to vector<8x32xf32>
    %64 = arith.addf %63, %62 : vector<8x32xf32>
    %65 = arith.divf %63, %64 : vector<8x32xf32>
    %66 = vector.extract_strided_slice %53 {offsets = [0, 64], sizes = [8, 32], strides = [1, 1]} : vector<8x128xf32> to vector<8x32xf32>
    %67 = math.tanh %66 : vector<8x32xf32>
    %68 = vector.extract_strided_slice %53 {offsets = [0, 96], sizes = [8, 32], strides = [1, 1]} : vector<8x128xf32> to vector<8x32xf32>
    %69 = arith.negf %68 : vector<8x32xf32>
    %70 = math.exp %69 : vector<8x32xf32>
    %cst_28 = arith.constant 1.000000e+00 : f32
    %71 = vector.broadcast %cst_28 : f32 to vector<8x32xf32>
    %72 = arith.addf %71, %70 : vector<8x32xf32>
    %73 = arith.divf %71, %72 : vector<8x32xf32>
    %74 = arith.mulf %65, %41 : vector<8x32xf32>
    %75 = arith.mulf %59, %67 : vector<8x32xf32>
    %76 = arith.addf %74, %75 : vector<8x32xf32>
    %77 = math.tanh %76 : vector<8x32xf32>
    %78 = arith.mulf %73, %77 : vector<8x32xf32>
    %79 = arith.index_cast %c1_i32 : i32 to index
    %c0_29 = arith.constant 0 : index
    %c0_30 = arith.constant 0 : index
    %80 = vector.load %arg17[%79, %c0_29, %c0_30] : memref<8x8x32xf32, #tpu.memory_space<vmem>>, vector<1x8x32xf32>
    %81 = vector.shape_cast %80 : vector<1x8x32xf32> to vector<8x32xf32>
    %82 = vector.shape_cast %78 : vector<8x32xf32> to vector<1x8x32xf32>
    tpu.vector_store %arg17[%79, %c0_29, %c0_30], %82 {strides = array<i32>} : memref<8x8x32xf32, #tpu.memory_space<vmem>>, vector<1x8x32xf32>,
    %c2_i32 = arith.constant 2 : i32
    %83 = arith.index_cast %c2_i32 : i32 to index
    %c0_31 = arith.constant 0 : index
    %c0_32 = arith.constant 0 : index
    %84 = vector.load %arg16[%83, %c0_31, %c0_32] : memref<8x8x128xf32, #tpu.memory_space<vmem>>, vector<1x8x128xf32>
    %85 = vector.shape_cast %84 : vector<1x8x128xf32> to vector<8x128xf32>
    %86 = arith.truncf %78 : vector<8x32xf32> to vector<8x32xbf16>
    %cst_33 = arith.constant dense<0.000000e+00> : vector<8x128xf32>
    %87 = tpu.matmul %86, %10, %cst_33 {dimension_numbers = #tpu.dot_dimension_numbers<[1], [0], [0], [1], [0, 0, 1, 1], [], []>} : vector<8x32xbf16>, vector<32x128xbf16>, vector<8x128xf32> -> vector<8x128xf32>
    %88 = arith.addf %85, %87 : vector<8x128xf32>
    %89 = vector.extract_strided_slice %88 {offsets = [0, 0], sizes = [8, 32], strides = [1, 1]} : vector<8x128xf32> to vector<8x32xf32>
    %90 = arith.negf %89 : vector<8x32xf32>
    %91 = math.exp %90 : vector<8x32xf32>
    %cst_34 = arith.constant 1.000000e+00 : f32
    %92 = vector.broadcast %cst_34 : f32 to vector<8x32xf32>
    %93 = arith.addf %92, %91 : vector<8x32xf32>
    %94 = arith.divf %92, %93 : vector<8x32xf32>
    %95 = vector.extract_strided_slice %88 {offsets = [0, 32], sizes = [8, 32], strides = [1, 1]} : vector<8x128xf32> to vector<8x32xf32>
    %96 = arith.negf %95 : vector<8x32xf32>
    %97 = math.exp %96 : vector<8x32xf32>
    %cst_35 = arith.constant 1.000000e+00 : f32
    %98 = vector.broadcast %cst_35 : f32 to vector<8x32xf32>
    %99 = arith.addf %98, %97 : vector<8x32xf32>
    %100 = arith.divf %98, %99 : vector<8x32xf32>
    %101 = vector.extract_strided_slice %88 {offsets = [0, 64], sizes = [8, 32], strides = [1, 1]} : vector<8x128xf32> to vector<8x32xf32>
    %102 = math.tanh %101 : vector<8x32xf32>
    %103 = vector.extract_strided_slice %88 {offsets = [0, 96], sizes = [8, 32], strides = [1, 1]} : vector<8x128xf32> to vector<8x32xf32>
    %104 = arith.negf %103 : vector<8x32xf32>
    %105 = math.exp %104 : vector<8x32xf32>
    %cst_36 = arith.constant 1.000000e+00 : f32
    %106 = vector.broadcast %cst_36 : f32 to vector<8x32xf32>
    %107 = arith.addf %106, %105 : vector<8x32xf32>
    %108 = arith.divf %106, %107 : vector<8x32xf32>
    %109 = arith.mulf %100, %76 : vector<8x32xf32>
    %110 = arith.mulf %94, %102 : vector<8x32xf32>
    %111 = arith.addf %109, %110 : vector<8x32xf32>
    %112 = math.tanh %111 : vector<8x32xf32>
    %113 = arith.mulf %108, %112 : vector<8x32xf32>
    %114 = arith.index_cast %c2_i32 : i32 to index
    %c0_37 = arith.constant 0 : index
    %c0_38 = arith.constant 0 : index
    %115 = vector.load %arg17[%114, %c0_37, %c0_38] : memref<8x8x32xf32, #tpu.memory_space<vmem>>, vector<1x8x32xf32>
    %116 = vector.shape_cast %115 : vector<1x8x32xf32> to vector<8x32xf32>
    %117 = vector.shape_cast %113 : vector<8x32xf32> to vector<1x8x32xf32>
    tpu.vector_store %arg17[%114, %c0_37, %c0_38], %117 {strides = array<i32>} : memref<8x8x32xf32, #tpu.memory_space<vmem>>, vector<1x8x32xf32>,
    %c3_i32 = arith.constant 3 : i32
    %118 = arith.index_cast %c3_i32 : i32 to index
    %c0_39 = arith.constant 0 : index
    %c0_40 = arith.constant 0 : index
    %119 = vector.load %arg16[%118, %c0_39, %c0_40] : memref<8x8x128xf32, #tpu.memory_space<vmem>>, vector<1x8x128xf32>
    %120 = vector.shape_cast %119 : vector<1x8x128xf32> to vector<8x128xf32>
    %121 = arith.truncf %113 : vector<8x32xf32> to vector<8x32xbf16>
    %cst_41 = arith.constant dense<0.000000e+00> : vector<8x128xf32>
    %122 = tpu.matmul %121, %10, %cst_41 {dimension_numbers = #tpu.dot_dimension_numbers<[1], [0], [0], [1], [0, 0, 1, 1], [], []>} : vector<8x32xbf16>, vector<32x128xbf16>, vector<8x128xf32> -> vector<8x128xf32>
    %123 = arith.addf %120, %122 : vector<8x128xf32>
    %124 = vector.extract_strided_slice %123 {offsets = [0, 0], sizes = [8, 32], strides = [1, 1]} : vector<8x128xf32> to vector<8x32xf32>
    %125 = arith.negf %124 : vector<8x32xf32>
    %126 = math.exp %125 : vector<8x32xf32>
    %cst_42 = arith.constant 1.000000e+00 : f32
    %127 = vector.broadcast %cst_42 : f32 to vector<8x32xf32>
    %128 = arith.addf %127, %126 : vector<8x32xf32>
    %129 = arith.divf %127, %128 : vector<8x32xf32>
    %130 = vector.extract_strided_slice %123 {offsets = [0, 32], sizes = [8, 32], strides = [1, 1]} : vector<8x128xf32> to vector<8x32xf32>
    %131 = arith.negf %130 : vector<8x32xf32>
    %132 = math.exp %131 : vector<8x32xf32>
    %cst_43 = arith.constant 1.000000e+00 : f32
    %133 = vector.broadcast %cst_43 : f32 to vector<8x32xf32>
    %134 = arith.addf %133, %132 : vector<8x32xf32>
    %135 = arith.divf %133, %134 : vector<8x32xf32>
    %136 = vector.extract_strided_slice %123 {offsets = [0, 64], sizes = [8, 32], strides = [1, 1]} : vector<8x128xf32> to vector<8x32xf32>
    %137 = math.tanh %136 : vector<8x32xf32>
    %138 = vector.extract_strided_slice %123 {offsets = [0, 96], sizes = [8, 32], strides = [1, 1]} : vector<8x128xf32> to vector<8x32xf32>
    %139 = arith.negf %138 : vector<8x32xf32>
    %140 = math.exp %139 : vector<8x32xf32>
    %cst_44 = arith.constant 1.000000e+00 : f32
    %141 = vector.broadcast %cst_44 : f32 to vector<8x32xf32>
    %142 = arith.addf %141, %140 : vector<8x32xf32>
    %143 = arith.divf %141, %142 : vector<8x32xf32>
    %144 = arith.mulf %135, %111 : vector<8x32xf32>
    %145 = arith.mulf %129, %137 : vector<8x32xf32>
    %146 = arith.addf %144, %145 : vector<8x32xf32>
    %147 = math.tanh %146 : vector<8x32xf32>
    %148 = arith.mulf %143, %147 : vector<8x32xf32>
    %149 = arith.index_cast %c3_i32 : i32 to index
    %c0_45 = arith.constant 0 : index
    %c0_46 = arith.constant 0 : index
    %150 = vector.load %arg17[%149, %c0_45, %c0_46] : memref<8x8x32xf32, #tpu.memory_space<vmem>>, vector<1x8x32xf32>
    %151 = vector.shape_cast %150 : vector<1x8x32xf32> to vector<8x32xf32>
    %152 = vector.shape_cast %148 : vector<8x32xf32> to vector<1x8x32xf32>
    tpu.vector_store %arg17[%149, %c0_45, %c0_46], %152 {strides = array<i32>} : memref<8x8x32xf32, #tpu.memory_space<vmem>>, vector<1x8x32xf32>,
    %c4_i32 = arith.constant 4 : i32
    %153 = arith.index_cast %c4_i32 : i32 to index
    %c0_47 = arith.constant 0 : index
    %c0_48 = arith.constant 0 : index
    %154 = vector.load %arg16[%153, %c0_47, %c0_48] : memref<8x8x128xf32, #tpu.memory_space<vmem>>, vector<1x8x128xf32>
    %155 = vector.shape_cast %154 : vector<1x8x128xf32> to vector<8x128xf32>
    %156 = arith.truncf %148 : vector<8x32xf32> to vector<8x32xbf16>
    %cst_49 = arith.constant dense<0.000000e+00> : vector<8x128xf32>
    %157 = tpu.matmul %156, %10, %cst_49 {dimension_numbers = #tpu.dot_dimension_numbers<[1], [0], [0], [1], [0, 0, 1, 1], [], []>} : vector<8x32xbf16>, vector<32x128xbf16>, vector<8x128xf32> -> vector<8x128xf32>
    %158 = arith.addf %155, %157 : vector<8x128xf32>
    %159 = vector.extract_strided_slice %158 {offsets = [0, 0], sizes = [8, 32], strides = [1, 1]} : vector<8x128xf32> to vector<8x32xf32>
    %160 = arith.negf %159 : vector<8x32xf32>
    %161 = math.exp %160 : vector<8x32xf32>
    %cst_50 = arith.constant 1.000000e+00 : f32
    %162 = vector.broadcast %cst_50 : f32 to vector<8x32xf32>
    %163 = arith.addf %162, %161 : vector<8x32xf32>
    %164 = arith.divf %162, %163 : vector<8x32xf32>
    %165 = vector.extract_strided_slice %158 {offsets = [0, 32], sizes = [8, 32], strides = [1, 1]} : vector<8x128xf32> to vector<8x32xf32>
    %166 = arith.negf %165 : vector<8x32xf32>
    %167 = math.exp %166 : vector<8x32xf32>
    %cst_51 = arith.constant 1.000000e+00 : f32
    %168 = vector.broadcast %cst_51 : f32 to vector<8x32xf32>
    %169 = arith.addf %168, %167 : vector<8x32xf32>
    %170 = arith.divf %168, %169 : vector<8x32xf32>
    %171 = vector.extract_strided_slice %158 {offsets = [0, 64], sizes = [8, 32], strides = [1, 1]} : vector<8x128xf32> to vector<8x32xf32>
    %172 = math.tanh %171 : vector<8x32xf32>
    %173 = vector.extract_strided_slice %158 {offsets = [0, 96], sizes = [8, 32], strides = [1, 1]} : vector<8x128xf32> to vector<8x32xf32>
    %174 = arith.negf %173 : vector<8x32xf32>
    %175 = math.exp %174 : vector<8x32xf32>
    %cst_52 = arith.constant 1.000000e+00 : f32
    %176 = vector.broadcast %cst_52 : f32 to vector<8x32xf32>
    %177 = arith.addf %176, %175 : vector<8x32xf32>
    %178 = arith.divf %176, %177 : vector<8x32xf32>
    %179 = arith.mulf %170, %146 : vector<8x32xf32>
    %180 = arith.mulf %164, %172 : vector<8x32xf32>
    %181 = arith.addf %179, %180 : vector<8x32xf32>
    %182 = math.tanh %181 : vector<8x32xf32>
    %183 = arith.mulf %178, %182 : vector<8x32xf32>
    %184 = arith.index_cast %c4_i32 : i32 to index
    %c0_53 = arith.constant 0 : index
    %c0_54 = arith.constant 0 : index
    %185 = vector.load %arg17[%184, %c0_53, %c0_54] : memref<8x8x32xf32, #tpu.memory_space<vmem>>, vector<1x8x32xf32>
    %186 = vector.shape_cast %185 : vector<1x8x32xf32> to vector<8x32xf32>
    %187 = vector.shape_cast %183 : vector<8x32xf32> to vector<1x8x32xf32>
    tpu.vector_store %arg17[%184, %c0_53, %c0_54], %187 {strides = array<i32>} : memref<8x8x32xf32, #tpu.memory_space<vmem>>, vector<1x8x32xf32>,
    %c5_i32 = arith.constant 5 : i32
    %188 = arith.index_cast %c5_i32 : i32 to index
    %c0_55 = arith.constant 0 : index
    %c0_56 = arith.constant 0 : index
    %189 = vector.load %arg16[%188, %c0_55, %c0_56] : memref<8x8x128xf32, #tpu.memory_space<vmem>>, vector<1x8x128xf32>
    %190 = vector.shape_cast %189 : vector<1x8x128xf32> to vector<8x128xf32>
    %191 = arith.truncf %183 : vector<8x32xf32> to vector<8x32xbf16>
    %cst_57 = arith.constant dense<0.000000e+00> : vector<8x128xf32>
    %192 = tpu.matmul %191, %10, %cst_57 {dimension_numbers = #tpu.dot_dimension_numbers<[1], [0], [0], [1], [0, 0, 1, 1], [], []>} : vector<8x32xbf16>, vector<32x128xbf16>, vector<8x128xf32> -> vector<8x128xf32>
    %193 = arith.addf %190, %192 : vector<8x128xf32>
    %194 = vector.extract_strided_slice %193 {offsets = [0, 0], sizes = [8, 32], strides = [1, 1]} : vector<8x128xf32> to vector<8x32xf32>
    %195 = arith.negf %194 : vector<8x32xf32>
    %196 = math.exp %195 : vector<8x32xf32>
    %cst_58 = arith.constant 1.000000e+00 : f32
    %197 = vector.broadcast %cst_58 : f32 to vector<8x32xf32>
    %198 = arith.addf %197, %196 : vector<8x32xf32>
    %199 = arith.divf %197, %198 : vector<8x32xf32>
    %200 = vector.extract_strided_slice %193 {offsets = [0, 32], sizes = [8, 32], strides = [1, 1]} : vector<8x128xf32> to vector<8x32xf32>
    %201 = arith.negf %200 : vector<8x32xf32>
    %202 = math.exp %201 : vector<8x32xf32>
    %cst_59 = arith.constant 1.000000e+00 : f32
    %203 = vector.broadcast %cst_59 : f32 to vector<8x32xf32>
    %204 = arith.addf %203, %202 : vector<8x32xf32>
    %205 = arith.divf %203, %204 : vector<8x32xf32>
    %206 = vector.extract_strided_slice %193 {offsets = [0, 64], sizes = [8, 32], strides = [1, 1]} : vector<8x128xf32> to vector<8x32xf32>
    %207 = math.tanh %206 : vector<8x32xf32>
    %208 = vector.extract_strided_slice %193 {offsets = [0, 96], sizes = [8, 32], strides = [1, 1]} : vector<8x128xf32> to vector<8x32xf32>
    %209 = arith.negf %208 : vector<8x32xf32>
    %210 = math.exp %209 : vector<8x32xf32>
    %cst_60 = arith.constant 1.000000e+00 : f32
    %211 = vector.broadcast %cst_60 : f32 to vector<8x32xf32>
    %212 = arith.addf %211, %210 : vector<8x32xf32>
    %213 = arith.divf %211, %212 : vector<8x32xf32>
    %214 = arith.mulf %205, %181 : vector<8x32xf32>
    %215 = arith.mulf %199, %207 : vector<8x32xf32>
    %216 = arith.addf %214, %215 : vector<8x32xf32>
    %217 = math.tanh %216 : vector<8x32xf32>
    %218 = arith.mulf %213, %217 : vector<8x32xf32>
    %219 = arith.index_cast %c5_i32 : i32 to index
    %c0_61 = arith.constant 0 : index
    %c0_62 = arith.constant 0 : index
    %220 = vector.load %arg17[%219, %c0_61, %c0_62] : memref<8x8x32xf32, #tpu.memory_space<vmem>>, vector<1x8x32xf32>
    %221 = vector.shape_cast %220 : vector<1x8x32xf32> to vector<8x32xf32>
    %222 = vector.shape_cast %218 : vector<8x32xf32> to vector<1x8x32xf32>
    tpu.vector_store %arg17[%219, %c0_61, %c0_62], %222 {strides = array<i32>} : memref<8x8x32xf32, #tpu.memory_space<vmem>>, vector<1x8x32xf32>,
    %c6_i32 = arith.constant 6 : i32
    %223 = arith.index_cast %c6_i32 : i32 to index
    %c0_63 = arith.constant 0 : index
    %c0_64 = arith.constant 0 : index
    %224 = vector.load %arg16[%223, %c0_63, %c0_64] : memref<8x8x128xf32, #tpu.memory_space<vmem>>, vector<1x8x128xf32>
    %225 = vector.shape_cast %224 : vector<1x8x128xf32> to vector<8x128xf32>
    %226 = arith.truncf %218 : vector<8x32xf32> to vector<8x32xbf16>
    %cst_65 = arith.constant dense<0.000000e+00> : vector<8x128xf32>
    %227 = tpu.matmul %226, %10, %cst_65 {dimension_numbers = #tpu.dot_dimension_numbers<[1], [0], [0], [1], [0, 0, 1, 1], [], []>} : vector<8x32xbf16>, vector<32x128xbf16>, vector<8x128xf32> -> vector<8x128xf32>
    %228 = arith.addf %225, %227 : vector<8x128xf32>
    %229 = vector.extract_strided_slice %228 {offsets = [0, 0], sizes = [8, 32], strides = [1, 1]} : vector<8x128xf32> to vector<8x32xf32>
    %230 = arith.negf %229 : vector<8x32xf32>
    %231 = math.exp %230 : vector<8x32xf32>
    %cst_66 = arith.constant 1.000000e+00 : f32
    %232 = vector.broadcast %cst_66 : f32 to vector<8x32xf32>
    %233 = arith.addf %232, %231 : vector<8x32xf32>
    %234 = arith.divf %232, %233 : vector<8x32xf32>
    %235 = vector.extract_strided_slice %228 {offsets = [0, 32], sizes = [8, 32], strides = [1, 1]} : vector<8x128xf32> to vector<8x32xf32>
    %236 = arith.negf %235 : vector<8x32xf32>
    %237 = math.exp %236 : vector<8x32xf32>
    %cst_67 = arith.constant 1.000000e+00 : f32
    %238 = vector.broadcast %cst_67 : f32 to vector<8x32xf32>
    %239 = arith.addf %238, %237 : vector<8x32xf32>
    %240 = arith.divf %238, %239 : vector<8x32xf32>
    %241 = vector.extract_strided_slice %228 {offsets = [0, 64], sizes = [8, 32], strides = [1, 1]} : vector<8x128xf32> to vector<8x32xf32>
    %242 = math.tanh %241 : vector<8x32xf32>
    %243 = vector.extract_strided_slice %228 {offsets = [0, 96], sizes = [8, 32], strides = [1, 1]} : vector<8x128xf32> to vector<8x32xf32>
    %244 = arith.negf %243 : vector<8x32xf32>
    %245 = math.exp %244 : vector<8x32xf32>
    %cst_68 = arith.constant 1.000000e+00 : f32
    %246 = vector.broadcast %cst_68 : f32 to vector<8x32xf32>
    %247 = arith.addf %246, %245 : vector<8x32xf32>
    %248 = arith.divf %246, %247 : vector<8x32xf32>
    %249 = arith.mulf %240, %216 : vector<8x32xf32>
    %250 = arith.mulf %234, %242 : vector<8x32xf32>
    %251 = arith.addf %249, %250 : vector<8x32xf32>
    %252 = math.tanh %251 : vector<8x32xf32>
    %253 = arith.mulf %248, %252 : vector<8x32xf32>
    %254 = arith.index_cast %c6_i32 : i32 to index
    %c0_69 = arith.constant 0 : index
    %c0_70 = arith.constant 0 : index
    %255 = vector.load %arg17[%254, %c0_69, %c0_70] : memref<8x8x32xf32, #tpu.memory_space<vmem>>, vector<1x8x32xf32>
    %256 = vector.shape_cast %255 : vector<1x8x32xf32> to vector<8x32xf32>
    %257 = vector.shape_cast %253 : vector<8x32xf32> to vector<1x8x32xf32>
    tpu.vector_store %arg17[%254, %c0_69, %c0_70], %257 {strides = array<i32>} : memref<8x8x32xf32, #tpu.memory_space<vmem>>, vector<1x8x32xf32>,
    %c7_i32 = arith.constant 7 : i32
    %258 = arith.index_cast %c7_i32 : i32 to index
    %c0_71 = arith.constant 0 : index
    %c0_72 = arith.constant 0 : index
    %259 = vector.load %arg16[%258, %c0_71, %c0_72] : memref<8x8x128xf32, #tpu.memory_space<vmem>>, vector<1x8x128xf32>
    %260 = vector.shape_cast %259 : vector<1x8x128xf32> to vector<8x128xf32>
    %261 = arith.truncf %253 : vector<8x32xf32> to vector<8x32xbf16>
    %cst_73 = arith.constant dense<0.000000e+00> : vector<8x128xf32>
    %262 = tpu.matmul %261, %10, %cst_73 {dimension_numbers = #tpu.dot_dimension_numbers<[1], [0], [0], [1], [0, 0, 1, 1], [], []>} : vector<8x32xbf16>, vector<32x128xbf16>, vector<8x128xf32> -> vector<8x128xf32>
    %263 = arith.addf %260, %262 : vector<8x128xf32>
    %264 = vector.extract_strided_slice %263 {offsets = [0, 0], sizes = [8, 32], strides = [1, 1]} : vector<8x128xf32> to vector<8x32xf32>
    %265 = arith.negf %264 : vector<8x32xf32>
    %266 = math.exp %265 : vector<8x32xf32>
    %cst_74 = arith.constant 1.000000e+00 : f32
    %267 = vector.broadcast %cst_74 : f32 to vector<8x32xf32>
    %268 = arith.addf %267, %266 : vector<8x32xf32>
    %269 = arith.divf %267, %268 : vector<8x32xf32>
    %270 = vector.extract_strided_slice %263 {offsets = [0, 32], sizes = [8, 32], strides = [1, 1]} : vector<8x128xf32> to vector<8x32xf32>
    %271 = arith.negf %270 : vector<8x32xf32>
    %272 = math.exp %271 : vector<8x32xf32>
    %cst_75 = arith.constant 1.000000e+00 : f32
    %273 = vector.broadcast %cst_75 : f32 to vector<8x32xf32>
    %274 = arith.addf %273, %272 : vector<8x32xf32>
    %275 = arith.divf %273, %274 : vector<8x32xf32>
    %276 = vector.extract_strided_slice %263 {offsets = [0, 64], sizes = [8, 32], strides = [1, 1]} : vector<8x128xf32> to vector<8x32xf32>
    %277 = math.tanh %276 : vector<8x32xf32>
    %278 = vector.extract_strided_slice %263 {offsets = [0, 96], sizes = [8, 32], strides = [1, 1]} : vector<8x128xf32> to vector<8x32xf32>
    %279 = arith.negf %278 : vector<8x32xf32>
    %280 = math.exp %279 : vector<8x32xf32>
    %cst_76 = arith.constant 1.000000e+00 : f32
    %281 = vector.broadcast %cst_76 : f32 to vector<8x32xf32>
    %282 = arith.addf %281, %280 : vector<8x32xf32>
    %283 = arith.divf %281, %282 : vector<8x32xf32>
    %284 = arith.mulf %275, %251 : vector<8x32xf32>
    %285 = arith.mulf %269, %277 : vector<8x32xf32>
    %286 = arith.addf %284, %285 : vector<8x32xf32>
    %287 = math.tanh %286 : vector<8x32xf32>
    %288 = arith.mulf %283, %287 : vector<8x32xf32>
    %289 = arith.index_cast %c7_i32 : i32 to index
    %c0_77 = arith.constant 0 : index
    %c0_78 = arith.constant 0 : index
    %290 = vector.load %arg17[%289, %c0_77, %c0_78] : memref<8x8x32xf32, #tpu.memory_space<vmem>>, vector<1x8x32xf32>
    %291 = vector.shape_cast %290 : vector<1x8x32xf32> to vector<8x32xf32>
    %292 = vector.shape_cast %288 : vector<8x32xf32> to vector<1x8x32xf32>
    tpu.vector_store %arg17[%289, %c0_77, %c0_78], %292 {strides = array<i32>} : memref<8x8x32xf32, #tpu.memory_space<vmem>>, vector<1x8x32xf32>,
    %c8_i32 = arith.constant 8 : i32
    %293 = vector.extract_strided_slice %288 {offsets = [0, 0], sizes = [2, 32], strides = [1, 1]} : vector<8x32xf32> to vector<2x32xf32>
    %c0_79 = arith.constant 0 : index
    %c0_80 = arith.constant 0 : index
    %294 = vector.load %arg14[%c0_79, %c0_80] : memref<2x32xf32, #tpu.memory_space<vmem>>, vector<2x32xf32>
    tpu.vector_store %arg14[%c0_79, %c0_80], %293 {strides = array<i32>} : memref<2x32xf32, #tpu.memory_space<vmem>>, vector<2x32xf32>,
    %295 = vector.extract_strided_slice %286 {offsets = [0, 0], sizes = [2, 32], strides = [1, 1]} : vector<8x32xf32> to vector<2x32xf32>
    %c0_81 = arith.constant 0 : index
    %c0_82 = arith.constant 0 : index
    %296 = vector.load %arg15[%c0_81, %c0_82] : memref<2x32xf32, #tpu.memory_space<vmem>>, vector<2x32xf32>
    tpu.vector_store %arg15[%c0_81, %c0_82], %295 {strides = array<i32>} : memref<2x32xf32, #tpu.memory_space<vmem>>, vector<2x32xf32>,
    %c0_83 = arith.constant 0 : index
    %c0_84 = arith.constant 0 : index
    %c0_85 = arith.constant 0 : index
    %297 = vector.load %arg17[%c0_83, %c0_84, %c0_85] : memref<8x8x32xf32, #tpu.memory_space<vmem>>, vector<8x8x32xf32>
    %c0_86 = arith.constant 0 : index
    %c0_87 = arith.constant 0 : index
    %298 = vector.load %arg8[%c0_86, %c0_87] : memref<32x32xbf16, #tpu.memory_space<vmem>>, vector<32x32xbf16>
    %c0_88 = arith.constant 0 : index
    %c0_89 = arith.constant 0 : index
    %299 = vector.load %arg9[%c0_88, %c0_89] : memref<32x32xbf16, #tpu.memory_space<vmem>>, vector<32x32xbf16>
    %c0_90 = arith.constant 0 : index
    %c0_91 = arith.constant 0 : index
    %300 = vector.load %arg10[%c0_90, %c0_91] : memref<32x32xbf16, #tpu.memory_space<vmem>>, vector<32x32xbf16>
    %c0_92 = arith.constant 0 : index
    %c0_93 = arith.constant 0 : index
    %301 = vector.load %arg11[%c0_92, %c0_93] : memref<32x32xbf16, #tpu.memory_space<vmem>>, vector<32x32xbf16>
    %c0_94 = arith.constant 0 : index
    %c0_95 = arith.constant 0 : index
    %302 = vector.load %arg12[%c0_94, %c0_95] : memref<1x32xf32, #tpu.memory_space<vmem>>, vector<1x32xf32>
    %303 = vector.extract_strided_slice %297 {offsets = [0, 0, 0], sizes = [8, 1, 32], strides = [1, 1, 1]} : vector<8x8x32xf32> to vector<8x1x32xf32>
    %304 = vector.shape_cast %303 : vector<8x1x32xf32> to vector<8x32xf32>
    %305 = arith.truncf %304 : vector<8x32xf32> to vector<8x32xbf16>
    %c0_96 = arith.constant 0 : index
    %c0_97 = arith.constant 0 : index
    %c0_98 = arith.constant 0 : index
    %306 = vector.load %arg6[%c0_96, %c0_97, %c0_98] : memref<2x4x32xf32, #tpu.memory_space<vmem>>, vector<1x4x32xf32>
    %307 = vector.shape_cast %306 : vector<1x4x32xf32> to vector<4x32xf32>
    %308 = arith.truncf %307 : vector<4x32xf32> to vector<4x32xbf16>
    %cst_99 = arith.constant dense<0.000000e+00> : vector<8x32xf32>
    %309 = tpu.matmul %305, %298, %cst_99 {dimension_numbers = #tpu.dot_dimension_numbers<[1], [0], [0], [1], [0, 0, 1, 1], [], []>} : vector<8x32xbf16>, vector<32x32xbf16>, vector<8x32xf32> -> vector<8x32xf32>
    %310 = arith.truncf %309 : vector<8x32xf32> to vector<8x32xbf16>
    %cst_100 = arith.constant dense<0.000000e+00> : vector<8x4xf32>
    %311 = tpu.matmul %310, %308, %cst_100 {dimension_numbers = #tpu.dot_dimension_numbers<[1], [1], [0], [0], [0, 0, 1, 0], [], []>} : vector<8x32xbf16>, vector<4x32xbf16>, vector<8x4xf32> -> vector<8x4xf32>
    %c0_101 = arith.constant 0 : index
    %c0_102 = arith.constant 0 : index
    %c0_103 = arith.constant 0 : index
    %312 = vector.load %arg7[%c0_101, %c0_102, %c0_103] : memref<2x1x4xf32, #tpu.memory_space<vmem>>, vector<1x1x4xf32>
    %313 = vector.shape_cast %312 : vector<1x1x4xf32> to vector<1x4xf32>
    %314 = vector.broadcast %313 : vector<1x4xf32> to vector<8x4xf32>
    %315 = arith.addf %311, %314 : vector<8x4xf32>
    %cst_104 = arith.constant dense<0xFF800000> : vector<8xf32>
    %316 = vector.multi_reduction <maximumf>, %315, %cst_104 [1] : vector<8x4xf32> to vector<8xf32>
    %317 = vector.shape_cast %316 : vector<8xf32> to vector<8x1xf32>
    %318 = vector.broadcast %317 : vector<8x1xf32> to vector<8x4xf32>
    %319 = arith.subf %315, %318 : vector<8x4xf32>
    %320 = math.exp %319 : vector<8x4xf32>
    %cst_105 = arith.constant dense<0.000000e+00> : vector<8xf32>
    %321 = vector.multi_reduction <add>, %320, %cst_105 [1] : vector<8x4xf32> to vector<8xf32>
    %322 = vector.shape_cast %321 : vector<8xf32> to vector<8x1xf32>
    %323 = tpu.reciprocal %322 {approx = true} : vector<8x1xf32> -> vector<8x1xf32>
    %324 = vector.broadcast %323 : vector<8x1xf32> to vector<8x4xf32>
    %325 = arith.mulf %320, %324 : vector<8x4xf32>
    %326 = arith.truncf %325 : vector<8x4xf32> to vector<8x4xbf16>
    %cst_106 = arith.constant dense<0.000000e+00> : vector<8x32xf32>
    %327 = tpu.matmul %326, %308, %cst_106 {dimension_numbers = #tpu.dot_dimension_numbers<[1], [0], [0], [1], [0, 0, 1, 1], [], []>} : vector<8x4xbf16>, vector<4x32xbf16>, vector<8x32xf32> -> vector<8x32xf32>
    %328 = arith.truncf %327 : vector<8x32xf32> to vector<8x32xbf16>
    %cst_107 = arith.constant dense<0.000000e+00> : vector<8x32xf32>
    %329 = tpu.matmul %328, %299, %cst_107 {dimension_numbers = #tpu.dot_dimension_numbers<[1], [0], [0], [1], [0, 0, 1, 1], [], []>} : vector<8x32xbf16>, vector<32x32xbf16>, vector<8x32xf32> -> vector<8x32xf32>
    %cst_108 = arith.constant dense<0.000000e+00> : vector<8x32xf32>
    %330 = tpu.matmul %305, %300, %cst_108 {dimension_numbers = #tpu.dot_dimension_numbers<[1], [0], [0], [1], [0, 0, 1, 1], [], []>} : vector<8x32xbf16>, vector<32x32xbf16>, vector<8x32xf32> -> vector<8x32xf32>
    %331 = arith.addf %329, %330 : vector<8x32xf32>
    %332 = math.tanh %331 : vector<8x32xf32>
    %333 = arith.truncf %332 : vector<8x32xf32> to vector<8x32xbf16>
    %cst_109 = arith.constant dense<0.000000e+00> : vector<8x32xf32>
    %334 = tpu.matmul %333, %301, %cst_109 {dimension_numbers = #tpu.dot_dimension_numbers<[1], [0], [0], [1], [0, 0, 1, 1], [], []>} : vector<8x32xbf16>, vector<32x32xbf16>, vector<8x32xf32> -> vector<8x32xf32>
    %335 = vector.broadcast %302 : vector<1x32xf32> to vector<8x32xf32>
    %336 = arith.addf %334, %335 : vector<8x32xf32>
    %c0_110 = arith.constant 0 : index
    %c0_111 = arith.constant 0 : index
    %c0_112 = arith.constant 0 : index
    %337 = vector.load %arg13[%c0_110, %c0_111, %c0_112] : memref<2x8x32xf32, #tpu.memory_space<vmem>>, vector<1x8x32xf32>
    %338 = vector.shape_cast %337 : vector<1x8x32xf32> to vector<8x32xf32>
    %339 = vector.shape_cast %336 : vector<8x32xf32> to vector<1x8x32xf32>
    tpu.vector_store %arg13[%c0_110, %c0_111, %c0_112], %339 {strides = array<i32>} : memref<2x8x32xf32, #tpu.memory_space<vmem>>, vector<1x8x32xf32>,
    %340 = vector.extract_strided_slice %297 {offsets = [0, 1, 0], sizes = [8, 1, 32], strides = [1, 1, 1]} : vector<8x8x32xf32> to vector<8x1x32xf32>
    %341 = vector.shape_cast %340 : vector<8x1x32xf32> to vector<8x32xf32>
    %342 = arith.truncf %341 : vector<8x32xf32> to vector<8x32xbf16>
    %c1 = arith.constant 1 : index
    %c0_113 = arith.constant 0 : index
    %c0_114 = arith.constant 0 : index
    %343 = vector.load %arg6[%c1, %c0_113, %c0_114] : memref<2x4x32xf32, #tpu.memory_space<vmem>>, vector<1x4x32xf32>
    %344 = vector.shape_cast %343 : vector<1x4x32xf32> to vector<4x32xf32>
    %345 = arith.truncf %344 : vector<4x32xf32> to vector<4x32xbf16>
    %cst_115 = arith.constant dense<0.000000e+00> : vector<8x32xf32>
    %346 = tpu.matmul %342, %298, %cst_115 {dimension_numbers = #tpu.dot_dimension_numbers<[1], [0], [0], [1], [0, 0, 1, 1], [], []>} : vector<8x32xbf16>, vector<32x32xbf16>, vector<8x32xf32> -> vector<8x32xf32>
    %347 = arith.truncf %346 : vector<8x32xf32> to vector<8x32xbf16>
    %cst_116 = arith.constant dense<0.000000e+00> : vector<8x4xf32>
    %348 = tpu.matmul %347, %345, %cst_116 {dimension_numbers = #tpu.dot_dimension_numbers<[1], [1], [0], [0], [0, 0, 1, 0], [], []>} : vector<8x32xbf16>, vector<4x32xbf16>, vector<8x4xf32> -> vector<8x4xf32>
    %c1_117 = arith.constant 1 : index
    %c0_118 = arith.constant 0 : index
    %c0_119 = arith.constant 0 : index
    %349 = vector.load %arg7[%c1_117, %c0_118, %c0_119] : memref<2x1x4xf32, #tpu.memory_space<vmem>>, vector<1x1x4xf32>
    %350 = vector.shape_cast %349 : vector<1x1x4xf32> to vector<1x4xf32>
    %351 = vector.broadcast %350 : vector<1x4xf32> to vector<8x4xf32>
    %352 = arith.addf %348, %351 : vector<8x4xf32>
    %cst_120 = arith.constant dense<0xFF800000> : vector<8xf32>
    %353 = vector.multi_reduction <maximumf>, %352, %cst_120 [1] : vector<8x4xf32> to vector<8xf32>
    %354 = vector.shape_cast %353 : vector<8xf32> to vector<8x1xf32>
    %355 = vector.broadcast %354 : vector<8x1xf32> to vector<8x4xf32>
    %356 = arith.subf %352, %355 : vector<8x4xf32>
    %357 = math.exp %356 : vector<8x4xf32>
    %cst_121 = arith.constant dense<0.000000e+00> : vector<8xf32>
    %358 = vector.multi_reduction <add>, %357, %cst_121 [1] : vector<8x4xf32> to vector<8xf32>
    %359 = vector.shape_cast %358 : vector<8xf32> to vector<8x1xf32>
    %360 = tpu.reciprocal %359 {approx = true} : vector<8x1xf32> -> vector<8x1xf32>
    %361 = vector.broadcast %360 : vector<8x1xf32> to vector<8x4xf32>
    %362 = arith.mulf %357, %361 : vector<8x4xf32>
    %363 = arith.truncf %362 : vector<8x4xf32> to vector<8x4xbf16>
    %cst_122 = arith.constant dense<0.000000e+00> : vector<8x32xf32>
    %364 = tpu.matmul %363, %345, %cst_122 {dimension_numbers = #tpu.dot_dimension_numbers<[1], [0], [0], [1], [0, 0, 1, 1], [], []>} : vector<8x4xbf16>, vector<4x32xbf16>, vector<8x32xf32> -> vector<8x32xf32>
    %365 = arith.truncf %364 : vector<8x32xf32> to vector<8x32xbf16>
    %cst_123 = arith.constant dense<0.000000e+00> : vector<8x32xf32>
    %366 = tpu.matmul %365, %299, %cst_123 {dimension_numbers = #tpu.dot_dimension_numbers<[1], [0], [0], [1], [0, 0, 1, 1], [], []>} : vector<8x32xbf16>, vector<32x32xbf16>, vector<8x32xf32> -> vector<8x32xf32>
    %cst_124 = arith.constant dense<0.000000e+00> : vector<8x32xf32>
    %367 = tpu.matmul %342, %300, %cst_124 {dimension_numbers = #tpu.dot_dimension_numbers<[1], [0], [0], [1], [0, 0, 1, 1], [], []>} : vector<8x32xbf16>, vector<32x32xbf16>, vector<8x32xf32> -> vector<8x32xf32>
    %368 = arith.addf %366, %367 : vector<8x32xf32>
    %369 = math.tanh %368 : vector<8x32xf32>
    %370 = arith.truncf %369 : vector<8x32xf32> to vector<8x32xbf16>
    %cst_125 = arith.constant dense<0.000000e+00> : vector<8x32xf32>
    %371 = tpu.matmul %370, %301, %cst_125 {dimension_numbers = #tpu.dot_dimension_numbers<[1], [0], [0], [1], [0, 0, 1, 1], [], []>} : vector<8x32xbf16>, vector<32x32xbf16>, vector<8x32xf32> -> vector<8x32xf32>
    %372 = vector.broadcast %302 : vector<1x32xf32> to vector<8x32xf32>
    %373 = arith.addf %371, %372 : vector<8x32xf32>
    %c1_126 = arith.constant 1 : index
    %c0_127 = arith.constant 0 : index
    %c0_128 = arith.constant 0 : index
    %374 = vector.load %arg13[%c1_126, %c0_127, %c0_128] : memref<2x8x32xf32, #tpu.memory_space<vmem>>, vector<1x8x32xf32>
    %375 = vector.shape_cast %374 : vector<1x8x32xf32> to vector<8x32xf32>
    %376 = vector.shape_cast %373 : vector<8x32xf32> to vector<1x8x32xf32>
    tpu.vector_store %arg13[%c1_126, %c0_127, %c0_128], %376 {strides = array<i32>} : memref<2x8x32xf32, #tpu.memory_space<vmem>>, vector<1x8x32xf32>,
    return
  }
}

</mosaic_0001>

<bundles_post_ra>
// kernel: speaker_decoder_forward.1
= control target key start
LH: loop header
LB: loop body
LE: loop exit
PB: predicated region body
PF: predicated region fallthrough
CT: control target
= control target key end

     0   :  { %21 = vsyncpa [#allocation5], 0  ;;  %v2047_v1 = vmov 0.0   ;;  %vm85_vm0 = vcmask 261120   ;;  %vm2048_vm1 = vmmov 0   ;;  %s2563_s0 = inlined_call_operand.vmem [shape: f32[8,8,32], index: 0, kind: input, shape index: {}]   ;;  %s2564_s1 = inlined_call_operand.vmem [shape: f32[8,32], index: 1, kind: input, shape index: {}]   ;;  %s2565_s2 = inlined_call_operand.vmem [shape: f32[8,32], index: 2, kind: input, shape index: {}]   ;;  %s2566_s3 = inlined_call_operand.vmem [shape: bf16[32,128], index: 3, kind: input, shape index: {}]   ;;  %s2567_s4 = inlined_call_operand.vmem [shape: bf16[32,128], index: 4, kind: input, shape index: {}]   ;;  %s2568_s5 = inlined_call_operand.vmem [shape: f32[1,128], index: 5, kind: input, shape index: {}]   ;;  %s2569_s6 = inlined_call_operand.vmem [shape: f32[2,4,32], index: 6, kind: input, shape index: {}]   ;;  %s2570_s7 = inlined_call_operand.vmem [shape: f32[2,1,4], index: 7, kind: input, shape index: {}]   ;;  %s2571_s8 = inlined_call_operand.vmem [shape: bf16[32,32], index: 8, kind: input, shape index: {}]   ;;  %s2572_s9 = inlined_call_operand.vmem [shape: bf16[32,32], index: 9, kind: input, shape index: {}]   ;;  %s2573_s10 = inlined_call_operand.vmem [shape: bf16[32,32], index: 10, kind: input, shape index: {}]   ;;  %s2574_s11 = inlined_call_operand.vmem [shape: bf16[32,32], index: 11, kind: input, shape index: {}]   ;;  %s2575_s12 = inlined_call_operand.vmem [shape: f32[1,32], index: 12, kind: input, shape index: {}]   ;;  %s2576_s13 = inlined_call_operand.hbm [shape: f32[2,8,32], index: 13, kind: output, shape index: {0}]   ;;  %s2577_s14 = inlined_call_operand.hbm [shape: f32[2,32], index: 14, kind: output, shape index: {1}]   ;;  %s2578_s15 = inlined_call_operand.hbm [shape: f32[2,32], index: 15, kind: output, shape index: {2}]  }
   0x1   :  { %v1889_v0 = vld [vmem:[%s2566_s3] sm:$0xff]   ;;  %1719 = vmatprep.subr.bf16.mxu1 %v2047_v1  ;;  %v1891_v3 = vld [vmem:[%s2566_s3 + $0x8] sm:$0xff]   ;;  %v52_v7 = vld [vmem:[%s2563_s0 + $0x10] sm:$0xff]  ;;  %1723 = vmatprep.mubr.msk.bf16.mxu1 %vm2048_vm1, %v2047_v1 }
   0x2   :  { %v2144_v2 = vld [vmem:[%s2567_s4] sm:$0xff]   ;;  %1707 = vmatprep.subr.bf16.mxu0 %v1889_v0  ;;  %v2153_v4 = vld [vmem:[%s2567_s4 + $0x8] sm:$0xff]   ;;  %v53_v9 = vld [vmem:[%s2563_s0 + $0x18] sm:$0xff] }
   0x3   :  { %1708 = vmatpush3.bf16.msra.mxu0 %v1889_v0  ;;  %1720 = vmatpush3.bf16.msra.mxu1 %v2144_v2  ;;  %v50_v5 = vld [vmem:[%s2563_s0] sm:$0xff]  ;;  %v51_v6 = vld [vmem:[%s2563_s0 + $0x8] sm:$0xff]  ;;  %v59_v11 = vpack.c.bf16 %v53_v9, %v52_v7 }
   0x4   :  { %1709 = vmatprep.subr.bf16.mxu0 %v1891_v3  ;;  %1721 = vmatprep.subr.bf16.mxu1 %v2047_v1  ;;  %v58_v8 = vpack.c.bf16 %v51_v6, %v50_v5  ;;  %v175_v10 = vld [vmem:[%s2564_s1] sm:$0xff] }
   0x5   :  { %v178_v12 = vpack.c.bf16 %v175_v10, %v175_v10 }
   0x6   :  { %1711 = vmatprep.mubr.msk.bf16.mxu0 %vm85_vm0, %v58_v8 }
   0x7   :  { %1710 = vmatpush3.bf16.msra.mxu0 %v1891_v3  ;;  %1722 = vmatpush3.bf16.msra.mxu1 %v2153_v4 }
   0x8   :  { %1727 = vmatprep.subr.bf16.mxu1 %v2047_v1  ;;  %1735 = vmatprep.subr.bf16.mxu0 %v2047_v1 }
   0xa   :  { %1712 = vmatmul.mubr.msk.bf16.vlgmr.msra.gmra.mrb[0].mxu0 %vm85_vm0, %v59_v11  ;;  %1724 = vmatmul.mubr.msk.bf16.vlgmr.msra.gmra.mrb[0].mxu1 %vm85_vm0, %v178_v12 }
   0xb   :  { %1728 = vmatpush3.bf16.msra.mxu1 %v2144_v2  ;;  %1731 = vmatprep.mubr.msk.bf16.mxu1 %vm2048_vm1, %v2047_v1 }
   0xc   :  { %22 = vsyncpa [#allocation7], 0  ;;  %1729 = vmatprep.subr.bf16.mxu1 %v2047_v1  ;;  %1736 = vmatpush3.bf16.msra.mxu0 %v2144_v2  ;;  %v2192_v13 = vld [vmem:[%s2568_s5] ss:$0 sm:$0xff]  ;;  %s2049_s20 = smov 64   ;;  %s2050_s22 = smov 32  }
   0xd   :  { %1737 = vmatprep.subr.bf16.mxu0 %v2047_v1  ;;  %v176_v25 = vld [vmem:[%s2565_s2] sm:$0xff]  ;;  %v55_v58 = vld [vmem:[%s2563_s0 + $0x28] sm:$0xff]  ;;  %v56_v59 = vld [vmem:[%s2563_s0 + $0x30] sm:$0xff]  ;;  %vm887_vm2 = vcmask 1041409   ;;  %vm890_vm3 = vcmask 1042434   ;;  %vm893_vm4 = vcmask 1043459  }
   0xe   :  { %v54_v57 = vld [vmem:[%s2563_s0 + $0x20] sm:$0xff]  ;;  %v57_v61 = vld [vmem:[%s2563_s0 + $0x38] sm:$0xff]  ;;  %vm896_vm5 = vcmask 1044484   ;;  %vm899_vm6 = vcmask 1045509   ;;  %vm902_vm7 = vcmask 1046534   ;;  %vm828_vm8 = vcmask 254976  }
   0xf   :  { %1730 = vmatpush3.bf16.msra.mxu1 %v2153_v4  ;;  %v60_v60 = vpack.c.bf16 %v55_v58, %v54_v57  ;;  %v61_v62 = vpack.c.bf16 %v57_v61, %v56_v59  ;;  %vm905_vm9 = vcmask 1047559   ;;  %vm1017_vm10 = vcmask 31744  }
  0x10   :  { %1738 = vmatpush3.bf16.msra.mxu0 %v2153_v4  ;;  %1743 = vmatprep.subr.bf16.mxu1 %v2047_v1  ;;  %vm1033_vm11 = vcmask 1041408  }
  0x11   :  { %1751 = vmatprep.subr.bf16.mxu0 %v2047_v1  ;;  %1715 = vmatprep.mubr.msk.bf16.mxu0 %vm85_vm0, %v60_v60 }
  0x12   :  { %1716 = vmatmul.mubr.msk.bf16.gmra.mrb[4].mxu0 %vm85_vm0, %v61_v62 }
  0x13   :  { %1739 = vmatprep.mubr.msk.bf16.mxu0 %vm2048_vm1, %v2047_v1 }
  0xdd   :  { %v2194_v14 = vpop.f32.mrb[0].mxu0  ;;  %v228_v15 = vpop.f32.mrb[0].mxu1 }
  0xde   :  { %v132_v16 = vpop.f32.mrb[1].mxu0  ;;  %v1725_v17 = vpop.f32.mrb[1].mxu1  ;;  %v141_v11 = vadd.f32 %v2194_v14, %v2192_v13 }
  0xdf   :  { %v133_v18 = vadd.f32 %v2192_v13, %v132_v16  ;;  %v2197_v19 = vpop.f32.mrb[2].mxu0  ;;  %v231_v20 = vpop.f32.mrb[2].mxu1 }
  0xe0   :  { %v135_v21 = vpop.f32.mrb[3].mxu0  ;;  %v1726_v22 = vpop.f32.mrb[3].mxu1 }
  0xe1   :  { %v234_v23 = vadd.f32 %v228_v15, %v133_v18  ;;  %v136_v41 = vadd.f32 %v2192_v13, %v135_v21 }
  0xe3   :  { %1901 = vtanh.f32 %v234_v23  ;;  %v1605_v26 = vmul.f32 -1.442695, %v234_v23 }
  0xe5   :  { %1903 = vpow2.f32 %v1605_v26  ;;  %v2243_v6 = vpop.f32.mrb[4].mxu0 }
  0xe6   :  { %v2245_v7 = vpop.f32.mrb[5].mxu0 }
  0xe7   :  { %v2247_v8 = vpop.f32.mrb[6].mxu0 }
  0xe8   :  { %v2249_v9 = vpop.f32.mrb[7].mxu0 }
  0xed   :  { %v1902_v24 = vpop.eup %1901 }
  0xee   :  { %248 = vrot.lane.b32.xlu0 %v1902_v24, %s2049_s20 }
  0xef   :  { %v1904_v27 = vpop.eup %1903 }
  0xf0   :  { %v238_v28 = vadd.f32 1.0, %v1904_v27 }
  0xf2   :  { %243 = vrot.lane.b32.xlu0 %v176_v25, %s2050_s22  ;;  %1905 = vrcp.f32 %v238_v28 }
  0xfc   :  { %v1906_v29 = vpop.eup %1905 }
 0x160   :  { %v249_v30 = vpop.permute.xlu0 %248 }
 0x161   :  { %v251_v31 = vmul.f32 %v1906_v29, %v249_v30 }
 0x163   :  { %253 = vrot.lane.b32.xlu1 %v251_v31, %s2050_s22 }
 0x164   :  { %v244_v32 = vpop.permute.xlu0 %243 }
 0x165   :  { %v246_v33 = vmul.f32 %v1906_v29, %v244_v32 }
 0x1d5   :  { %v254_v34 = vpop.permute.xlu1 %253 }
 0x1d6   :  { %v256_v35 = vadd.f32 %v254_v34, %v246_v33  ;;  %v144_v34 = vadd.f32 %v2197_v19, %v2192_v13 }
 0x1d8   :  { %1907 = vtanh.f32 %v256_v35 }
 0x1e2   :  { %v1908_v36 = vpop.eup %1907 }
 0x1e3   :  { %259 = vrot.lane.b32.xlu1 %v1908_v36, %s2049_s20 }
 0x255   :  { %v260_v37 = vpop.permute.xlu1 %259 }
 0x256   :  { %v2206_v38 = vmul.f32 %v1906_v29, %v260_v37 }
 0x258   :  { %v270_v39 = vpack.c.bf16 %v2206_v38, %v2206_v38 }
 0x25a   :  { %272 = vrot.lane.b32.xlu0 %v270_v39, %s2050_s22 }
 0x2cc   :  { %v273_v40 = vpop.permute.xlu0 %272 }
 0x2cd   :  { %1732 = vmatmul.mubr.msk.bf16.vlgmr.msra.gmra.mrb[4].mxu1 %vm85_vm0, %v273_v40 }
 0x2ce   :  { %1744 = vmatpush3.bf16.msra.mxu1 %v2144_v2  ;;  %1747 = vmatprep.mubr.msk.bf16.mxu1 %vm2048_vm1, %v2047_v1 }
 0x2cf   :  { %1745 = vmatprep.subr.bf16.mxu1 %v2047_v1 }
 0x2d2   :  { %1746 = vmatpush3.bf16.msra.mxu1 %v2153_v4 }
 0x2d3   :  { %1759 = vmatprep.subr.bf16.mxu1 %v2047_v1 }
 0x3a0   :  { %v311_v42 = vpop.f32.mrb[4].mxu1 }
 0x3a1   :  { %v317_v43 = vadd.f32 %v311_v42, %v136_v41  ;;  %v1733_v44 = vpop.f32.mrb[5].mxu1 }
 0x3a2   :  { %v314_v45 = vpop.f32.mrb[6].mxu1 }
 0x3a3   :  { %1909 = vtanh.f32 %v317_v43  ;;  %v1734_v46 = vpop.f32.mrb[7].mxu1  ;;  %v1607_v48 = vmul.f32 -1.442695, %v317_v43 }
 0x3a5   :  { %1911 = vpow2.f32 %v1607_v48 }
 0x3ad   :  { %v1910_v47 = vpop.eup %1909 }
 0x3ae   :  { %327 = vrot.lane.b32.xlu1 %v1910_v47, %s2049_s20 }
 0x3af   :  { %v1912_v49 = vpop.eup %1911 }
 0x3b0   :  { %v321_v50 = vadd.f32 1.0, %v1912_v49 }
 0x3b2   :  { %1913 = vrcp.f32 %v321_v50 }
 0x3bc   :  { %v1914_v51 = vpop.eup %1913 }
 0x3bd   :  { %v325_v54 = vmul.f32 %v1914_v51, %v256_v35 }
 0x420   :  { %v328_v52 = vpop.permute.xlu1 %327 }
 0x421   :  { %v330_v53 = vmul.f32 %v1914_v51, %v328_v52 }
 0x423   :  { %332 = vrot.lane.b32.xlu0 %v330_v53, %s2050_s22 }
 0x495   :  { %v333_v55 = vpop.permute.xlu0 %332 }
 0x496   :  { %v335_v56 = vadd.f32 %v333_v55, %v325_v54  ;;  %v149_v55 = vadd.f32 %v2192_v13, %v2245_v7 }
 0x498   :  { %1915 = vtanh.f32 %v335_v56 }
 0x4a2   :  { %v1916_v63 = vpop.eup %1915 }
 0x4a3   :  { %338 = vrot.lane.b32.xlu1 %v1916_v63, %s2049_s20 }
 0x515   :  { %v339_v0 = vpop.permute.xlu1 %338 }
 0x516   :  { %v2238_v3 = vmul.f32 %v1914_v51, %v339_v0 }
 0x518   :  { %v350_v5 = vpack.c.bf16 %v2238_v3, %v2238_v3 }
 0x51a   :  { %352 = vrot.lane.b32.xlu0 %v350_v5, %s2050_s22 }
 0x58c   :  { %v353_v10 = vpop.permute.xlu0 %352 }
 0x58d   :  { %1740 = vmatmul.mubr.msk.bf16.vlgmr.msra.gmra.mrb[8].mxu0 %vm85_vm0, %v353_v10 }
 0x58e   :  { %1752 = vmatpush3.bf16.msra.mxu0 %v2144_v2  ;;  %1755 = vmatprep.mubr.msk.bf16.mxu0 %vm2048_vm1, %v2047_v1 }
 0x58f   :  { %1753 = vmatprep.subr.bf16.mxu0 %v2047_v1 }
 0x592   :  { %1754 = vmatpush3.bf16.msra.mxu0 %v2153_v4 }
 0x593   :  { %1767 = vmatprep.subr.bf16.mxu0 %v2047_v1 }
 0x660   :  { %v391_v12 = vpop.f32.mrb[8].mxu0 }
 0x661   :  { %v397_v15 = vadd.f32 %v391_v12, %v141_v11  ;;  %v1741_v16 = vpop.f32.mrb[9].mxu0 }
 0x662   :  { %v394_v17 = vpop.f32.mrb[10].mxu0 }
 0x663   :  { %1917 = vtanh.f32 %v397_v15  ;;  %v1742_v18 = vpop.f32.mrb[11].mxu0  ;;  %v1609_v21 = vmul.f32 -1.442695, %v397_v15 }
 0x665   :  { %1919 = vpow2.f32 %v1609_v21 }
 0x66d   :  { %v1918_v20 = vpop.eup %1917 }
 0x66e   :  { %407 = vrot.lane.b32.xlu1 %v1918_v20, %s2049_s20 }
 0x66f   :  { %v1920_v22 = vpop.eup %1919 }
 0x670   :  { %v401_v23 = vadd.f32 1.0, %v1920_v22  ;;  %v152_v22 = vadd.f32 %v2192_v13, %v2249_v9 }
 0x672   :  { %1921 = vrcp.f32 %v401_v23 }
 0x67c   :  { %v1922_v24 = vpop.eup %1921 }
 0x67d   :  { %v405_v14 = vmul.f32 %v1922_v24, %v335_v56 }
 0x6e0   :  { %v408_v25 = vpop.permute.xlu1 %407 }
 0x6e1   :  { %v410_v26 = vmul.f32 %v1922_v24, %v408_v25 }
 0x6e3   :  { %412 = vrot.lane.b32.xlu0 %v410_v26, %s2050_s22 }
 0x755   :  { %v413_v27 = vpop.permute.xlu0 %412 }
 0x756   :  { %v415_v28 = vadd.f32 %v413_v27, %v405_v14 }
 0x758   :  { %1923 = vtanh.f32 %v415_v28 }
 0x762   :  { %v1924_v29 = vpop.eup %1923 }
 0x763   :  { %418 = vrot.lane.b32.xlu1 %v1924_v29, %s2049_s20 }
 0x7d5   :  { %v419_v30 = vpop.permute.xlu1 %418 }
 0x7d6   :  { %v2263_v31 = vmul.f32 %v1922_v24, %v419_v30 }
 0x7d8   :  { %v430_v32 = vpack.c.bf16 %v2263_v31, %v2263_v31 }
 0x7da   :  { %432 = vrot.lane.b32.xlu0 %v430_v32, %s2050_s22 }
 0x84c   :  { %v433_v33 = vpop.permute.xlu0 %432 }
 0x84d   :  { %1748 = vmatmul.mubr.msk.bf16.vlgmr.msra.gmra.mrb[8].mxu1 %vm85_vm0, %v433_v33 }
 0x84e   :  { %1760 = vmatpush3.bf16.msra.mxu1 %v2144_v2  ;;  %1763 = vmatprep.mubr.msk.bf16.mxu1 %vm2048_vm1, %v2047_v1 }
 0x84f   :  { %1761 = vmatprep.subr.bf16.mxu1 %v2047_v1 }
 0x852   :  { %1762 = vmatpush3.bf16.msra.mxu1 %v2153_v4 }
 0x853   :  { %1775 = vmatprep.subr.bf16.mxu1 %v2047_v1 }
 0x920   :  { %v471_v35 = vpop.f32.mrb[8].mxu1 }
 0x921   :  { %v477_v36 = vadd.f32 %v471_v35, %v144_v34  ;;  %v1749_v37 = vpop.f32.mrb[9].mxu1 }
 0x922   :  { %v474_v39 = vpop.f32.mrb[10].mxu1 }
 0x923   :  { %1925 = vtanh.f32 %v477_v36  ;;  %v1750_v40 = vpop.f32.mrb[11].mxu1  ;;  %v1611_v42 = vmul.f32 -1.442695, %v477_v36 }
 0x925   :  { %1927 = vpow2.f32 %v1611_v42 }
 0x92d   :  { %v1926_v41 = vpop.eup %1925 }
 0x92e   :  { %487 = vrot.lane.b32.xlu1 %v1926_v41, %s2049_s20  ;;  %v157_v41 = vadd.f32 %v2243_v6, %v2192_v13 }
 0x92f   :  { %v1928_v43 = vpop.eup %1927 }
 0x930   :  { %v481_v44 = vadd.f32 1.0, %v1928_v43 }
 0x932   :  { %1929 = vrcp.f32 %v481_v44 }
 0x93c   :  { %v1930_v45 = vpop.eup %1929 }
 0x93d   :  { %v485_v19 = vmul.f32 %v1930_v45, %v415_v28 }
 0x9a0   :  { %v488_v46 = vpop.permute.xlu1 %487 }
 0x9a1   :  { %v490_v47 = vmul.f32 %v1930_v45, %v488_v46 }
 0x9a3   :  { %492 = vrot.lane.b32.xlu0 %v490_v47, %s2050_s22 }
 0xa15   :  { %v493_v48 = vpop.permute.xlu0 %492 }
 0xa16   :  { %v495_v49 = vadd.f32 %v493_v48, %v485_v19 }
 0xa18   :  { %1931 = vtanh.f32 %v495_v49 }
 0xa22   :  { %v1932_v50 = vpop.eup %1931 }
 0xa23   :  { %498 = vrot.lane.b32.xlu1 %v1932_v50, %s2049_s20 }
 0xa95   :  { %v499_v51 = vpop.permute.xlu1 %498 }
 0xa96   :  { %v2280_v52 = vmul.f32 %v1930_v45, %v499_v51 }
 0xa98   :  { %v510_v53 = vpack.c.bf16 %v2280_v52, %v2280_v52 }
 0xa9a   :  { %512 = vrot.lane.b32.xlu0 %v510_v53, %s2050_s22 }
 0xb0c   :  { %v513_v54 = vpop.permute.xlu0 %512 }
 0xb0d   :  { %1756 = vmatmul.mubr.msk.bf16.vlgmr.msra.gmra.mrb[12].mxu0 %vm85_vm0, %v513_v54 }
 0xb0e   :  { %1768 = vmatpush3.bf16.msra.mxu0 %v2144_v2  ;;  %1771 = vmatprep.mubr.msk.bf16.mxu0 %vm2048_vm1, %v2047_v1 }
 0xb0f   :  { %1769 = vmatprep.subr.bf16.mxu0 %v2047_v1 }
 0xb12   :  { %1770 = vmatpush3.bf16.msra.mxu0 %v2153_v4 }
 0xb13   :  { %1783 = vmatprep.subr.bf16.mxu0 %v2047_v1 }
 0xbe0   :  { %v551_v56 = vpop.f32.mrb[12].mxu0 }
 0xbe1   :  { %v557_v57 = vadd.f32 %v551_v56, %v149_v55  ;;  %v1757_v58 = vpop.f32.mrb[13].mxu0 }
 0xbe2   :  { %v554_v59 = vpop.f32.mrb[14].mxu0 }
 0xbe3   :  { %1933 = vtanh.f32 %v557_v57  ;;  %v1758_v60 = vpop.f32.mrb[15].mxu0  ;;  %v1613_v62 = vmul.f32 -1.442695, %v557_v57 }
 0xbe5   :  { %1935 = vpow2.f32 %v1613_v62 }
 0xbed   :  { %v1934_v61 = vpop.eup %1933 }
 0xbee   :  { %567 = vrot.lane.b32.xlu1 %v1934_v61, %s2049_s20  ;;  %v160_v61 = vadd.f32 %v2247_v8, %v2192_v13 }
 0xbef   :  { %v1936_v63 = vpop.eup %1935 }
 0xbf0   :  { %v561_v0 = vadd.f32 1.0, %v1936_v63 }
 0xbf2   :  { %1937 = vrcp.f32 %v561_v0 }
 0xbfc   :  { %v1938_v5 = vpop.eup %1937 }
 0xbfd   :  { %v565_v7 = vmul.f32 %v1938_v5, %v495_v49 }
 0xc60   :  { %v568_v10 = vpop.permute.xlu1 %567 }
 0xc61   :  { %v570_v11 = vmul.f32 %v1938_v5, %v568_v10 }
 0xc63   :  { %572 = vrot.lane.b32.xlu0 %v570_v11, %s2050_s22 }
 0xcd5   :  { %v573_v12 = vpop.permute.xlu0 %572 }
 0xcd6   :  { %v575_v15 = vadd.f32 %v573_v12, %v565_v7 }
 0xcd8   :  { %1939 = vtanh.f32 %v575_v15 }
 0xce2   :  { %v1940_v16 = vpop.eup %1939 }
 0xce3   :  { %578 = vrot.lane.b32.xlu1 %v1940_v16, %s2049_s20 }
 0xd55   :  { %v579_v17 = vpop.permute.xlu1 %578 }
 0xd56   :  { %v2297_v18 = vmul.f32 %v1938_v5, %v579_v17 }
 0xd58   :  { %v590_v20 = vpack.c.bf16 %v2297_v18, %v2297_v18 }
 0xd5a   :  { %592 = vrot.lane.b32.xlu0 %v590_v20, %s2050_s22 }
 0xdcc   :  { %v593_v21 = vpop.permute.xlu0 %592 }
 0xdcd   :  { %1764 = vmatmul.mubr.msk.bf16.vlgmr.msra.gmra.mrb[12].mxu1 %vm85_vm0, %v593_v21 }
 0xdce   :  { %1776 = vmatpush3.bf16.msra.mxu1 %v2144_v2  ;;  %1779 = vmatprep.mubr.msk.bf16.mxu1 %vm2048_vm1, %v2047_v1 }
 0xdcf   :  { %1777 = vmatprep.subr.bf16.mxu1 %v2047_v1 }
 0xdd2   :  { %1778 = vmatpush3.bf16.msra.mxu1 %v2153_v4 }
 0xdd3   :  { %1791 = vmatprep.subr.bf16.mxu1 %v2047_v1 }
 0xea0   :  { %v631_v23 = vpop.f32.mrb[12].mxu1 }
 0xea1   :  { %v637_v24 = vadd.f32 %v631_v23, %v152_v22  ;;  %v1765_v25 = vpop.f32.mrb[13].mxu1 }
 0xea2   :  { %v634_v26 = vpop.f32.mrb[14].mxu1 }
 0xea3   :  { %1941 = vtanh.f32 %v637_v24  ;;  %v1766_v14 = vpop.f32.mrb[15].mxu1  ;;  %v1615_v2 = vmul.f32 -1.442695, %v637_v24 }
 0xea5   :  { %1943 = vpow2.f32 %v1615_v2 }
 0xead   :  { %v1942_v27 = vpop.eup %1941 }
 0xeae   :  { %647 = vrot.lane.b32.xlu1 %v1942_v27, %s2049_s20 }
 0xeaf   :  { %v1944_v28 = vpop.eup %1943 }
 0xeb0   :  { %v641_v29 = vadd.f32 1.0, %v1944_v28 }
 0xeb2   :  { %1945 = vrcp.f32 %v641_v29 }
 0xebc   :  { %v1946_v4 = vpop.eup %1945 }
 0xebd   :  { %v645_v9 = vmul.f32 %v1946_v4, %v575_v15 }
 0xf20   :  { %v648_v30 = vpop.permute.xlu1 %647 }
 0xf21   :  { %v650_v32 = vmul.f32 %v1946_v4, %v648_v30 }
 0xf23   :  { %652 = vrot.lane.b32.xlu0 %v650_v32, %s2050_s22 }
 0xf95   :  { %v653_v33 = vpop.permute.xlu0 %652 }
 0xf96   :  { %v655_v34 = vadd.f32 %v653_v33, %v645_v9  ;;  %v868_v9 = vld [vmem:[%s2569_s6] sm:$0xf] }
 0xf98   :  { %1947 = vtanh.f32 %v655_v34 }
 0xfa2   :  { %v1948_v35 = vpop.eup %1947 }
 0xfa3   :  { %658 = vrot.lane.b32.xlu1 %v1948_v35, %s2049_s20 }
0x1015   :  { %v659_v36 = vpop.permute.xlu1 %658 }
0x1016   :  { %v2314_v37 = vmul.f32 %v1946_v4, %v659_v36  ;;  %v2372_v4 = vld [vmem:[%s2571_s8 + $0x8] sm:$0xff]  }
0x1018   :  { %v670_v39 = vpack.c.bf16 %v2314_v37, %v2314_v37 }
0x101a   :  { %672 = vrot.lane.b32.xlu0 %v670_v39, %s2050_s22 }
0x108c   :  { %v673_v40 = vpop.permute.xlu0 %672 }
0x108d   :  { %1772 = vmatmul.mubr.msk.bf16.vlgmr.msra.gmra.mrb[16].mxu0 %vm85_vm0, %v673_v40 }
0x108e   :  { %1787 = vmatprep.mubr.msk.bf16.mxu0 %vm2048_vm1, %v2047_v1 }
0x1160   :  { %v711_v42 = vpop.f32.mrb[16].mxu0 }
0x1161   :  { %v717_v43 = vadd.f32 %v711_v42, %v157_v41  ;;  %v1773_v44 = vpop.f32.mrb[17].mxu0 }
0x1162   :  { %v714_v45 = vpop.f32.mrb[18].mxu0 }
0x1163   :  { %1949 = vtanh.f32 %v717_v43  ;;  %v1774_v46 = vpop.f32.mrb[19].mxu0  ;;  %v1617_v19 = vmul.f32 -1.442695, %v717_v43 }
0x1165   :  { %1951 = vpow2.f32 %v1617_v19 }
0x116d   :  { %v1950_v47 = vpop.eup %1949 }
0x116e   :  { %727 = vrot.lane.b32.xlu1 %v1950_v47, %s2049_s20 }
0x116f   :  { %v1952_v48 = vpop.eup %1951 }
0x1170   :  { %v721_v49 = vadd.f32 1.0, %v1952_v48 }
0x1172   :  { %1953 = vrcp.f32 %v721_v49 }
0x117c   :  { %v1954_v50 = vpop.eup %1953 }
0x117d   :  { %v725_v6 = vmul.f32 %v1954_v50, %v655_v34  ;;  %v2382_v34 = vpack.c.bf16 %v868_v9, %v868_v9 }
0x117f   :  { %v975_v35 = vsel %vm85_vm0, %v2382_v34, 0 }
0x11e0   :  { %v728_v51 = vpop.permute.xlu1 %727 }
0x11e1   :  { %v730_v53 = vmul.f32 %v1954_v50, %v728_v51 }
0x11e3   :  { %732 = vrot.lane.b32.xlu0 %v730_v53, %s2050_s22 }
0x1255   :  { %v733_v54 = vpop.permute.xlu0 %732 }
0x1256   :  { %v735_v55 = vadd.f32 %v733_v54, %v725_v6 }
0x1258   :  { %1955 = vtanh.f32 %v735_v55 }
0x1262   :  { %v1956_v56 = vpop.eup %1955 }
0x1263   :  { %738 = vrot.lane.b32.xlu1 %v1956_v56, %s2049_s20 }
0x12d5   :  { %v739_v57 = vpop.permute.xlu1 %738 }
0x12d6   :  { %v741_v58 = vmul.f32 %v1954_v50, %v739_v57 }
0x12d8   :  { %v750_v59 = vpack.c.bf16 %v741_v58, %v741_v58 }
0x12da   :  { %752 = vrot.lane.b32.xlu0 %v750_v59, %s2050_s22 }
0x134c   :  { %v753_v60 = vpop.permute.xlu0 %752 }
0x134d   :  { %1780 = vmatmul.mubr.msk.bf16.vlgmr.msra.gmra.mrb[16].mxu1 %vm85_vm0, %v753_v60 }
0x134e   :  { %1793 = vmatprep.mubr.msk.bf16.mxu1 %vm2048_vm1, %v2047_v1  ;;  %1792 = vmatpush3.bf16.xpose.msra.mxu1 %v975_v35 }
0x134f   :  { %1803 = vmatprep.subr.bf16.mxu1 %v2047_v1 }
0x1420   :  { %v791_v62 = vpop.f32.mrb[16].mxu1 }
0x1421   :  { %v797_v63 = vadd.f32 %v791_v62, %v160_v61  ;;  %v1781_v0 = vpop.f32.mrb[17].mxu1 }
0x1422   :  { %v794_v5 = vpop.f32.mrb[18].mxu1 }
0x1423   :  { %1957 = vtanh.f32 %v797_v63  ;;  %v1782_v10 = vpop.f32.mrb[19].mxu1  ;;  %v1619_v7 = vmul.f32 -1.442695, %v797_v63 }
0x1425   :  { %1959 = vpow2.f32 %v1619_v7 }
0x142d   :  { %v1958_v11 = vpop.eup %1957 }
0x142e   :  { %807 = vrot.lane.b32.xlu1 %v1958_v11, %s2049_s20 }
0x142f   :  { %v1960_v12 = vpop.eup %1959 }
0x1430   :  { %v801_v15 = vadd.f32 1.0, %v1960_v12 }
0x1432   :  { %1961 = vrcp.f32 %v801_v15 }
0x143c   :  { %v1962_v16 = vpop.eup %1961 }
0x143d   :  { %v805_v13 = vmul.f32 %v1962_v16, %v735_v55 }
0x14a0   :  { %v808_v17 = vpop.permute.xlu1 %807 }
0x14a1   :  { %v810_v20 = vmul.f32 %v1962_v16, %v808_v17 }
0x14a3   :  { %812 = vrot.lane.b32.xlu0 %v810_v20, %s2050_s22 }
0x14a7   :  { %343 = vrot.lane.b32.xlu0 %v2238_v3, %s2050_s22 }
0x14ab   :  { %264 = vrot.lane.b32.xlu0 %v2206_v38, %s2050_s22 }
0x14af   :  { %583 = vrot.lane.b32.xlu0 %v2297_v18, %s2050_s22 }
0x14b3   :  { %743 = vrot.lane.b32.xlu0 %v741_v58, %s2050_s22 }
0x1515   :  { %v813_v8 = vpop.permute.xlu0 %812 }
0x1516   :  { %v2342_v21 = vadd.f32 %v813_v8, %v805_v13 }
0x1518   :  { %1963 = vtanh.f32 %v2342_v21 }
0x1519   :  { %v344_v22 = vpop.permute.xlu0 %343 }
0x151a   :  { %347 = vst.msk [vmem:[#allocation3 + $0x8] sm:$0xff] %vm85_vm0, %v344_v22 }
0x151d   :  { %v265_v23 = vpop.permute.xlu0 %264 }
0x151e   :  { %267 = vst.msk [vmem:[#allocation3] sm:$0xff] %vm85_vm0, %v265_v23 }
0x1521   :  { %v584_v3 = vpop.permute.xlu0 %583  ;;  %v836_v38 = vld [vmem:[#allocation3 + $0x8] sm:$0xff] }
0x1522   :  { %v1964_v24 = vpop.eup %1963  ;;  %587 = vst.msk [vmem:[#allocation3 + $0x20] sm:$0xff] %vm85_vm0, %v584_v3  ;;  %v861_v14 = vpack.c.bf16 %v836_v38, %v836_v38 }
0x1523   :  { %818 = vrot.lane.b32.xlu1 %v1964_v24, %s2049_s20 }
0x1524   :  { %v2354_v2 = vunpack.c.l.b16 %v861_v14  ;;  %v2412_v14 = vld [vmem:[%s2573_s10] sm:$0xff]  }
0x1525   :  { %v744_v18 = vpop.permute.xlu0 %743  ;;  %v835_v25 = vld [vmem:[#allocation3] sm:$0xff] }
0x1526   :  { %747 = vst.msk [vmem:[#allocation3 + $0x30] sm:$0xff] %vm85_vm0, %v744_v18  ;;  %v860_v26 = vpack.c.bf16 %v835_v25, %v835_v25  ;;  %v886_v0 = vrot.slane %v2354_v2, 7 }
0x1527   :  { %423 = vrot.lane.b32.xlu1 %v2263_v31, %s2050_s22  ;;  %v2366_v31 = vld [vmem:[%s2571_s8] sm:$0xff]  }
0x1528   :  { %v2352_v27 = vunpack.c.l.b16 %v860_v26  ;;  %1784 = vmatpush3.bf16.msra.mxu0 %v2366_v31 }
0x1529   :  { %1785 = vmatprep.subr.bf16.mxu0 %v2047_v1  ;;  %v839_v36 = vld [vmem:[#allocation3 + $0x20] sm:$0xff] }
0x152a   :  { %v1251_v28 = vrot.slane %v2352_v27, 1  ;;  %v864_v41 = vpack.c.bf16 %v839_v36, %v839_v36  ;;  %v888_v10 = vsel %vm887_vm2, %v886_v0, %v2352_v27 }
0x152b   :  { %503 = vrot.lane.b32.xlu1 %v2280_v52, %s2050_s22 }
0x152c   :  { %v1252_v29 = vsel %vm887_vm2, %v2354_v2, %v1251_v28  ;;  %1786 = vmatpush3.bf16.msra.mxu0 %v2372_v4  ;;  %v882_v19 = vunpack.c.l.b16 %v864_v41 }
0x152d   :  { %1797 = vmatprep.subr.bf16.mxu0 %v2047_v1  ;;  %v841_v42 = vld [vmem:[#allocation3 + $0x30] sm:$0xff] }
0x152e   :  { %v866_v47 = vpack.c.bf16 %v841_v42, %v841_v42  ;;  %v1257_v54 = vrot.slane %v882_v19, 5 }
0x152f   :  { %663 = vrot.lane.b32.xlu1 %v2314_v37, %s2050_s22 }
0x1530   :  { %v884_v6 = vunpack.c.l.b16 %v866_v47 }
0x1532   :  { %v1261_v59 = vrot.slane %v884_v6, 3  ;;  %v901_v22 = vrot.slane %v884_v6, 2 }
0x1595   :  { %v819_v52 = vpop.permute.xlu1 %818 }
0x1596   :  { %v821_v30 = vmul.f32 %v1962_v16, %v819_v52  ;;  %v895_v16 = vrot.slane %v882_v19, 4  ;;  %v2419_v52 = vld [vmem:[%s2573_s10 + $0x8] sm:$0xff]   ;;  %s2051_s10 = smov 96  }
0x1598   :  { %823 = vrot.lane.b32.xlu1 %v821_v30, %s2050_s22  ;;  %v1623_v30 = vld [vmem:[%s2570_s7] ss:$0 sm:$0xff] }
0x1599   :  { %v424_v32 = vpop.permute.xlu1 %423 }
0x159a   :  { %427 = vst.msk [vmem:[#allocation3 + $0x10] sm:$0xff] %vm85_vm0, %v424_v32 }
0x159d   :  { %v504_v33 = vpop.permute.xlu1 %503 }
0x159e   :  { %507 = vst.msk [vmem:[#allocation3 + $0x18] sm:$0xff] %vm85_vm0, %v504_v33 }
0x15a1   :  { %v664_v37 = vpop.permute.xlu1 %663  ;;  %v837_v39 = vld [vmem:[#allocation3 + $0x10] sm:$0xff] }
0x15a2   :  { %667 = vst.msk [vmem:[#allocation3 + $0x28] sm:$0xff] %vm85_vm0, %v664_v37  ;;  %v862_v40 = vpack.c.bf16 %v837_v39, %v837_v39 }
0x15a4   :  { %v880_v43 = vunpack.c.l.b16 %v862_v40 }
0x15a5   :  { %v838_v44 = vld [vmem:[#allocation3 + $0x18] sm:$0xff] }
0x15a6   :  { %v863_v45 = vpack.c.bf16 %v838_v44, %v838_v44  ;;  %v1253_v46 = vrot.slane %v880_v43, 7  ;;  %v889_v63 = vrot.slane %v880_v43, 6  ;;  %v1034_v44 = vsel %vm1033_vm11, %v2382_v34, 0 }
0x15a8   :  { %v881_v48 = vunpack.c.l.b16 %v863_v45  ;;  %v1254_v49 = vsel %vm890_vm3, %v1253_v46, %v1252_v29  ;;  %v891_v11 = vsel %vm890_vm3, %v889_v63, %v888_v10  ;;  %v2441_v45 = vld [vmem:[%s2572_s9] sm:$0xff]   ;;  %v2447_v46 = vld [vmem:[%s2572_s9 + $0x8] sm:$0xff]  }
0x15a9   :  { %v840_v50 = vld [vmem:[#allocation3 + $0x28] sm:$0xff] }
0x15aa   :  { %v865_v51 = vpack.c.bf16 %v840_v50, %v840_v50  ;;  %v1255_v53 = vrot.slane %v881_v48, 6  ;;  %v892_v5 = vrot.slane %v881_v48, 5 }
0x15ac   :  { %v883_v55 = vunpack.c.l.b16 %v865_v51  ;;  %v1256_v56 = vsel %vm893_vm4, %v1255_v53, %v1254_v49  ;;  %v894_v7 = vsel %vm893_vm4, %v892_v5, %v891_v11 }
0x15ad   :  { %v1258_v57 = vsel %vm896_vm5, %v1257_v54, %v1256_v56  ;;  %v897_v20 = vsel %vm896_vm5, %v895_v16, %v894_v7  ;;  %v2462_v54 = vld [vmem:[%s2574_s11] sm:$0xff]  }
0x15ae   :  { %v1259_v58 = vrot.slane %v883_v55, 4  ;;  %v898_v12 = vrot.slane %v883_v55, 3  ;;  %v2469_v55 = vld [vmem:[%s2574_s11 + $0x8] sm:$0xff]  }
0x15b0   :  { %v1260_v60 = vsel %vm899_vm6, %v1259_v58, %v1258_v57  ;;  %v900_v8 = vsel %vm899_vm6, %v898_v12, %v897_v20 }
0x15b1   :  { %v1262_v61 = vsel %vm902_vm7, %v1261_v59, %v1260_v60  ;;  %v903_v24 = vsel %vm902_vm7, %v901_v22, %v900_v8  ;;  %v1639_v8 = vld [vmem:[%s2570_s7 + $0x1] ss:$0 sm:$0xff]  ;;  %s2052_s7 = smov [#allocation6]  }
0x15b2   :  { %s1570_s0 = sshll.u32 %s2052_s7, 4  ;;  %s1571_s0 = int_to_ptr.vmem [resolvable:$true] %s1570_s0 }
0x15b3   :  { %s1977_s3 = scalar_lea.vmem %s1571_s0, 32  ;;  %p1982_p1 = scmp.lt.s32.totalorder %s1571_s0, %s1571_s0 }
0x15b4   :  { %p1978_p0 = scmp.ne.s32.totalorder %s1571_s0, %s1977_s3  ;;  %p1983_p2 = scmp.lt.s32.totalorder %s1977_s3, %s1977_s3 }
0x15b6   :  { %p1984_p3 = por %p1983_p2, %p1982_p1 }
0x15b8   :  { %p1985_p4 = pnand %p1984_p3, %p1978_p0 }
0x160a   :  { %v824_v62 = vpop.permute.xlu1 %823 }
0x160b   :  { %827 = vst.msk [vmem:[#allocation3 + $0x38] sm:$0xff] %vm85_vm0, %v824_v62 }
0x160c   :  { %829 = vst.msk [vmem:[#allocation6] sm:$0x3] %vm828_vm8, %v824_v62 }
0x1612   :  { %v842_v15 = vld [vmem:[#allocation3 + $0x38] sm:$0xff] }
0x1613   :  { %v867_v17 = vpack.c.bf16 %v842_v15, %v842_v15 }
0x1615   :  { %v885_v13 = vunpack.c.l.b16 %v867_v17 }
0x1617   :  { %v904_v23 = vrot.slane %v885_v13, 1  ;;  %v1263_v3 = vrot.slane %v885_v13, 2 }
0x1619   :  { %v906_v38 = vsel %vm905_vm9, %v904_v23, %v903_v24  ;;  %v2404_v18 = vsel %vm905_vm9, %v1263_v3, %v1262_v61 }
0x161a   :  { %v907_v25 = vpack.c.b16 %v906_v38, %v906_v38  ;;  %v1265_v62 = vpack.c.b16 %v2404_v18, %v2404_v18 }
0x161c   :  { %1788 = vmatmul.mubr.msk.bf16.vlgmr.msra.gmra.mrb[20].mxu0 %vm85_vm0, %v907_v25 }
0x161d   :  { %1799 = vmatprep.mubr.msk.bf16.mxu0 %vm2048_vm1, %v2047_v1  ;;  %1798 = vmatpush3.bf16.msra.mxu0 %v1034_v44 }
0x161e   :  { %1819 = vmatprep.subr.bf16.mxu0 %v2047_v1 }
0x16ef   :  { %v957_v26 = vpop.f32.mrb[20].mxu0 }
0x16f0   :  { %v963_v27 = vpack.c.bf16 %v957_v26, %v957_v26  ;;  %v1789_v2 = vpop.f32.mrb[21].mxu0 }
0x16f1   :  { %v960_v28 = vpop.f32.mrb[22].mxu0 }
0x16f2   :  { %v1790_v29 = vpop.f32.mrb[23].mxu0  ;;  %1794 = vmatmul.mubr.msk.bf16.vlgmr.msra.gmra.mrb[20].mxu1 %vm85_vm0, %v963_v27 }
0x16f3   :  { %1804 = vmatpush3.bf16.msra.mxu1 %v2412_v14  ;;  %1807 = vmatprep.mubr.msk.bf16.mxu1 %vm2048_vm1, %v2047_v1 }
0x16f4   :  { %1805 = vmatprep.subr.bf16.mxu1 %v2047_v1 }
0x16f7   :  { %1806 = vmatpush3.bf16.msra.mxu1 %v2419_v52 }
0x16f8   :  { %1811 = vmatprep.subr.bf16.mxu1 %v2047_v1 }
0x16fa   :  { %1808 = vmatmul.mubr.msk.bf16.vlgmr.msra.gmra.mrb[24].mxu1 %vm85_vm0, %v907_v25 }
0x16fb   :  { %1815 = vmatprep.mubr.msk.bf16.mxu1 %vm2048_vm1, %v2047_v1  ;;  %1812 = vmatpush3.bf16.msra.mxu1 %v2441_v45 }
0x16fc   :  { %1813 = vmatprep.subr.bf16.mxu1 %v2047_v1 }
0x16ff   :  { %1814 = vmatpush3.bf16.msra.mxu1 %v2447_v46 }
0x1700   :  { %1835 = vmatprep.subr.bf16.mxu1 %v2047_v1 }
0x17c5   :  { %v1011_v32 = vpop.f32.mrb[20].mxu1 }
0x17c6   :  { %v1012_v9 = vadd.f32 %v1623_v30, %v1011_v32  ;;  %v1795_v33 = vpop.f32.mrb[21].mxu1 }
0x17c7   :  { %v1014_v35 = vpop.f32.mrb[22].mxu1 }
0x17c8   :  { %v1796_v36 = vpop.f32.mrb[23].mxu1  ;;  %v1018_v37 = vsel %vm1017_vm10, %v1012_v9, -inf }
0x17c9   :  { %1019 = vmax.xlane.f32.xlu0 %v1018_v37 }
0x1856   :  { %v1020_v39 = vpop.xlane.xlu0 %1019 }
0x1857   :  { %v1021_v40 = vsub.f32 %v1012_v9, %v1020_v39 }
0x1859   :  { %v1022_v41 = vmul.f32 1.442695, %v1021_v40 }
0x185b   :  { %1965 = vpow2.f32 %v1022_v41 }
0x1865   :  { %v1966_v42 = vpop.eup %1965 }
0x1866   :  { %v1024_v43 = vsel %vm1017_vm10, %v1966_v42, 0.0 }
0x1867   :  { %1025 = vadd.xlane.f32.xlu1 %v1024_v43 }
0x1878   :  { %831 = vrot.lane.b32.xlu1 %v2342_v21, %s2051_s10 }
0x18f4   :  { %v1026_v21 = vpop.xlane.xlu1 %1025 }
0x18f5   :  { %1967 = vrcp.f32 %v1026_v21 }
0x18f8   :  { %v832_v34 = vpop.permute.xlu1 %831 }
0x18f9   :  { %834 = vst.msk [vmem:[#allocation8] sm:$0x3] %vm828_vm8, %v832_v34 }
0x18ff   :  { %v1968_v47 = vpop.eup %1967 }
0x1900   :  { %v1028_v19 = vmul.f32 %v1968_v47, %v1966_v42 }
0x1902   :  { %v1029_v48 = vpack.c.bf16 %v1028_v19, %v1028_v19 }
0x1904   :  { %1800 = vmatmul.mubr.msk.bf16.vlgmr.msra.gmra.mrb[24].mxu0 %vm1017_vm10, %v1029_v48 }
0x1905   :  { %1823 = vmatprep.mubr.msk.bf16.mxu0 %vm2048_vm1, %v2047_v1  ;;  %1820 = vmatpush3.bf16.msra.mxu0 %v2462_v54 }
0x1906   :  { %1821 = vmatprep.subr.bf16.mxu0 %v2047_v1 }
0x1909   :  { %1822 = vmatpush3.bf16.msra.mxu0 %v2469_v55 }
0x190a   :  { %1827 = vmatprep.subr.bf16.mxu0 %v2047_v1 }
0x19d7   :  { %v1070_v49 = vpop.f32.mrb[24].mxu0 }
0x19d8   :  { %v1076_v50 = vpack.c.bf16 %v1070_v49, %v1070_v49  ;;  %v1801_v51 = vpop.f32.mrb[25].mxu0 }
0x19d9   :  { %v1073_v53 = vpop.f32.mrb[26].mxu0 }
0x19da   :  { %v1802_v6 = vpop.f32.mrb[27].mxu0  ;;  %1816 = vmatmul.mubr.msk.bf16.vlgmr.msra.gmra.mrb[24].mxu1 %vm85_vm0, %v1076_v50 }
0x19db   :  { %1837 = vmatprep.mubr.msk.bf16.mxu1 %vm2048_vm1, %v2047_v1 }
0x1aad   :  { %v1178_v56 = vpop.f32.mrb[24].mxu1 }
0x1aae   :  { %1969 = vtanh.f32 %v1178_v56  ;;  %v1817_v57 = vpop.f32.mrb[25].mxu1 }
0x1aaf   :  { %v1181_v58 = vpop.f32.mrb[26].mxu1 }
0x1ab0   :  { %v1818_v59 = vpop.f32.mrb[27].mxu1 }
0x1ab8   :  { %v1970_v60 = vpop.eup %1969 }
0x1ab9   :  { %v1185_v61 = vpack.c.bf16 %v1970_v60, %v1970_v60 }
0x1abb   :  { %1824 = vmatmul.mubr.msk.bf16.vlgmr.msra.gmra.mrb[28].mxu0 %vm85_vm0, %v1185_v61 }
0x1abc   :  { %1828 = vmatpush3.bf16.msra.mxu0 %v2366_v31  ;;  %1831 = vmatprep.mubr.msk.bf16.mxu0 %vm2048_vm1, %v2047_v1  ;;  %v1636_v31 = vld [vmem:[%s2569_s6 + $0x4] sm:$0xf] }
0x1abd   :  { %1829 = vmatprep.subr.bf16.mxu0 %v2047_v1  ;;  %v1250_v63 = vpack.c.bf16 %v1636_v31, %v1636_v31 }
0x1abf   :  { %v1322_v0 = vsel %vm85_vm0, %v1250_v63, 0  ;;  %v1379_v28 = vsel %vm1033_vm11, %v1250_v63, 0 }
0x1ac0   :  { %1830 = vmatpush3.bf16.msra.mxu0 %v2372_v4  ;;  %1836 = vmatpush3.bf16.xpose.msra.mxu1 %v1322_v0  ;;  %v2493_v4 = vld [vmem:[%s2575_s12] ss:$0 sm:$0xff] }
0x1ac1   :  { %1841 = vmatprep.subr.bf16.mxu0 %v2047_v1  ;;  %1847 = vmatprep.subr.bf16.mxu1 %v2047_v1 }
0x1ac3   :  { %1832 = vmatmul.mubr.msk.bf16.vlgmr.msra.gmra.mrb[32].mxu0 %vm85_vm0, %v1265_v62 }
0x1ac4   :  { %1843 = vmatprep.mubr.msk.bf16.mxu0 %vm2048_vm1, %v2047_v1  ;;  %1842 = vmatpush3.bf16.msra.mxu0 %v1379_v28 }
0x1ac5   :  { %1863 = vmatprep.subr.bf16.mxu0 %v2047_v1 }
0x1b8e   :  { %v1241_v5 = vpop.f32.mrb[28].mxu0 }
0x1b8f   :  { %v1242_v10 = vadd.f32 %v2493_v4, %v1241_v5  ;;  %v1825_v11 = vpop.f32.mrb[29].mxu0 }
0x1b90   :  { %v1244_v7 = vpop.f32.mrb[30].mxu0 }
0x1b91   :  { %1247 = vst.msk [vmem:[#allocation4] sm:$0xff] %vm85_vm0, %v1242_v10  ;;  %v1826_v12 = vpop.f32.mrb[31].mxu0 }
0x1b96   :  { %v1303_v15 = vpop.f32.mrb[32].mxu0 }
0x1b97   :  { %v1309_v16 = vpack.c.bf16 %v1303_v15, %v1303_v15  ;;  %v1833_v17 = vpop.f32.mrb[33].mxu0 }
0x1b98   :  { %v1306_v20 = vpop.f32.mrb[34].mxu0 }
0x1b99   :  { %v1834_v13 = vpop.f32.mrb[35].mxu0  ;;  %1838 = vmatmul.mubr.msk.bf16.vlgmr.msra.gmra.mrb[28].mxu1 %vm85_vm0, %v1309_v16 }
0x1b9a   :  { %1848 = vmatpush3.bf16.msra.mxu1 %v2412_v14  ;;  %1851 = vmatprep.mubr.msk.bf16.mxu1 %vm2048_vm1, %v2047_v1 }
0x1b9b   :  { %1849 = vmatprep.subr.bf16.mxu1 %v2047_v1 }
0x1b9e   :  { %1850 = vmatpush3.bf16.msra.mxu1 %v2419_v52 }
0x1b9f   :  { %1855 = vmatprep.subr.bf16.mxu1 %v2047_v1 }
0x1ba1   :  { %1852 = vmatmul.mubr.msk.bf16.vlgmr.msra.gmra.mrb[32].mxu1 %vm85_vm0, %v1265_v62 }
0x1ba2   :  { %1856 = vmatpush3.bf16.msra.mxu1 %v2441_v45  ;;  %1859 = vmatprep.mubr.msk.bf16.mxu1 %vm2048_vm1, %v2047_v1 }
0x1ba3   :  { %1857 = vmatprep.subr.bf16.mxu1 %v2047_v1 }
0x1ba6   :  { %1858 = vmatpush3.bf16.msra.mxu1 %v2447_v46 }
0x1c6c   :  { %v1358_v22 = vpop.f32.mrb[28].mxu1 }
0x1c6d   :  { %v1359_v23 = vadd.f32 %v1639_v8, %v1358_v22  ;;  %v1839_v3 = vpop.f32.mrb[29].mxu1 }
0x1c6e   :  { %v1361_v24 = vpop.f32.mrb[30].mxu1 }
0x1c6f   :  { %v1840_v38 = vpop.f32.mrb[31].mxu1  ;;  %v1364_v18 = vsel %vm1017_vm10, %v1359_v23, -inf }
0x1c70   :  { %1365 = vmax.xlane.f32.xlu0 %v1364_v18 }
0x1cfd   :  { %v1366_v25 = vpop.xlane.xlu0 %1365 }
0x1cfe   :  { %v1367_v26 = vsub.f32 %v1359_v23, %v1366_v25 }
0x1d00   :  { %v1368_v14 = vmul.f32 1.442695, %v1367_v26 }
0x1d02   :  { %1971 = vpow2.f32 %v1368_v14 }
0x1d0c   :  { %v1972_v27 = vpop.eup %1971 }
0x1d0d   :  { %v1370_v2 = vsel %vm1017_vm10, %v1972_v27, 0.0 }
0x1d0e   :  { %1371 = vadd.xlane.f32.xlu0 %v1370_v2 }
0x1d9b   :  { %v1372_v29 = vpop.xlane.xlu0 %1371 }
0x1d9c   :  { %1973 = vrcp.f32 %v1372_v29 }
0x1da6   :  { %v1974_v52 = vpop.eup %1973 }
0x1da7   :  { %v1374_v30 = vmul.f32 %v1974_v52, %v1972_v27 }
0x1da9   :  { %v1375_v32 = vpack.c.bf16 %v1374_v30, %v1374_v30 }
0x1dab   :  { %1844 = vmatmul.mubr.msk.bf16.vlgmr.msra.gmra.mrb[36].mxu0 %vm1017_vm10, %v1375_v32 }
0x1dac   :  { %1864 = vmatpush3.bf16.msra.mxu0 %v2462_v54  ;;  %1867 = vmatprep.mubr.msk.bf16.mxu0 %vm2048_vm1, %v2047_v1 }
0x1dad   :  { %1865 = vmatprep.subr.bf16.mxu0 %v2047_v1 }
0x1db0   :  { %1866 = vmatpush3.bf16.msra.mxu0 %v2469_v55 }
0x1e7e   :  { %v1415_v9 = vpop.f32.mrb[36].mxu0 }
0x1e7f   :  { %v1421_v33 = vpack.c.bf16 %v1415_v9, %v1415_v9  ;;  %v1845_v35 = vpop.f32.mrb[37].mxu0 }
0x1e80   :  { %v1418_v36 = vpop.f32.mrb[38].mxu0 }
0x1e81   :  { %v1846_v37 = vpop.f32.mrb[39].mxu0  ;;  %1860 = vmatmul.mubr.msk.bf16.vlgmr.msra.gmra.mrb[32].mxu1 %vm85_vm0, %v1421_v33 }
0x1f54   :  { %v1499_v39 = vpop.f32.mrb[32].mxu1 }
0x1f55   :  { %1975 = vtanh.f32 %v1499_v39  ;;  %v1861_v40 = vpop.f32.mrb[33].mxu1 }
0x1f56   :  { %v1502_v41 = vpop.f32.mrb[34].mxu1 }
0x1f57   :  { %v1862_v42 = vpop.f32.mrb[35].mxu1 }
0x1f5f   :  { %v1976_v43 = vpop.eup %1975 }
0x1f60   :  { %v1506_v44 = vpack.c.bf16 %v1976_v43, %v1976_v43 }
0x1f62   :  { %1868 = vmatmul.mubr.msk.bf16.vlgmr.msra.gmra.mrb[40].mxu0 %vm85_vm0, %v1506_v44 }
0x1f63   :  { %1988 = shalt.err (!%p1985_p4)
}
0x1f64   :  { %s1989_s16 = scalar_lea.hbm %s2577_s14, 32 }
0x1f65   :  { %p1990_p5 = scmp.ne.s32.totalorder %s2577_s14, %s1989_s16  ;;  %p1993_p6 = scmp.lt.u32.totalorder %s1989_s16, %s2577_s14 }
0x1f67   :  { %p1995_p7 = pnand %p1993_p6, %p1990_p5 }
0x1f69   :  { %1998 = shalt.err (!%p1995_p7)
}
0x1f6a   :  { %1573 = dma.vmem_to_hbm [thread:$0]  %s1571_s0, 32, %s2577_s14, [#allocation7]  }
0x1f6b   :  { %s2053_s5 = smov [#allocation8]  }
0x1f6c   :  { %s1580_s10 = sshll.u32 %s2053_s5, 4  ;;  %s1581_s10 = int_to_ptr.vmem [resolvable:$true] %s1580_s10 }
0x1f6d   :  { %s1999_s21 = scalar_lea.vmem %s1581_s10, 32  ;;  %p2004_p9 = scmp.lt.s32.totalorder %s1581_s10, %s1581_s10 }
0x1f6e   :  { %p2000_p8 = scmp.ne.s32.totalorder %s1581_s10, %s1999_s21  ;;  %p2005_p10 = scmp.lt.s32.totalorder %s1999_s21, %s1999_s21 }
0x1f70   :  { %p2006_p11 = por %p2005_p10, %p2004_p9 }
0x1f72   :  { %p2007_p12 = pnand %p2006_p11, %p2000_p8 }
0x1f74   :  { %2010 = shalt.err (!%p2007_p12)
}
0x1f75   :  { %s2011_s23 = scalar_lea.hbm %s2578_s15, 32 }
0x1f76   :  { %p2012_p13 = scmp.ne.s32.totalorder %s2578_s15, %s2011_s23  ;;  %p2015_p0 = scmp.lt.u32.totalorder %s2011_s23, %s2578_s15 }
0x1f78   :  { %p2017_p1 = pnand %p2015_p0, %p2012_p13 }
0x1f7a   :  { %2020 = shalt.err (!%p2017_p1)
}
0x1f7b   :  { %1583 = dma.vmem_to_hbm [thread:$0]  %s1581_s10, 32, %s2578_s15, [#allocation7]  }
0x1f7c   :  { %s2054_s27 = smov [#allocation4]  }
0x1f7d   :  { %s1557_s28 = sshll.u32 %s2054_s27, 4  ;;  %s1558_s28 = int_to_ptr.vmem [resolvable:$true] %s1557_s28 }
0x1f7e   :  { %s2021_s29 = scalar_lea.vmem %s1558_s28, 256  ;;  %p2026_p3 = scmp.lt.s32.totalorder %s1558_s28, %s1558_s28 }
0x1f7f   :  { %p2022_p2 = scmp.ne.s32.totalorder %s1558_s28, %s2021_s29  ;;  %p2027_p4 = scmp.lt.s32.totalorder %s2021_s29, %s2021_s29 }
0x1f81   :  { %p2028_p5 = por %p2027_p4, %p2026_p3 }
0x1f83   :  { %p2029_p6 = pnand %p2028_p5, %p2022_p2 }
0x2035   :  { %v1544_v1 = vpop.f32.mrb[40].mxu0 }
0x2036   :  { %v1545_v45 = vadd.f32 %v2493_v4, %v1544_v1  ;;  %v1869_v46 = vpop.f32.mrb[41].mxu0 }
0x2037   :  { %v1547_v21 = vpop.f32.mrb[42].mxu0 }
0x2038   :  { %1551 = vst.msk [vmem:[#allocation4 + $0x8] sm:$0xff] %vm85_vm0, %v1545_v45  ;;  %v1870_v34 = vpop.f32.mrb[43].mxu0 }
0x2039   :  { %2032 = shalt.err (!%p2029_p6)
}
0x203a   :  { %s2033_s12 = scalar_lea.hbm %s2576_s13, 256 }
0x203b   :  { %p2034_p7 = scmp.ne.s32.totalorder %s2576_s13, %s2033_s12  ;;  %p2037_p8 = scmp.lt.u32.totalorder %s2033_s12, %s2576_s13 }
0x203d   :  { %p2039_p9 = pnand %p2037_p8, %p2034_p7 }
0x203f   :  { %2042 = shalt.err (!%p2039_p9)
}
0x2040   :  { %s2055_s4 = smov 128   ;;  %s2056_s16 = smov 8  }
0x2041   :  { %1563 = dma.vmem_to_hbm [thread:$0]  %s1558_s28, 256, %s2576_s13, [#allocation5], %s2055_s4, %s2055_s4, %s2056_s16  }
0x2042   :  { %2043 = dma.done.wait [#allocation5], 256  }
0x2043   :  { %2044 = vsyncadd [#allocation5], 4294967040 }
0x2044   :  { %2045 = dma.done.wait [#allocation7], 64  }
0x2045   :  { %2046 = vsyncadd [#allocation7], 4294967232 }
0x2046   :  { %1593 = vsyncpa [#allocation5], 1 }
0x2047   :  { %1594 = vsyncpa [#allocation7], 1 }

</bundles_post_ra>
